<compile_context>
chip_gen: v5e
topology: v5e:2x2
jax: 0.10.0
libtpu: 0.0.40
codegen_flags: <defaults>
</compile_context>

<pallas_src>
import functools

import jax
import jax.numpy as jnp
from jax.experimental import pallas as pl
from jax.experimental.pallas import tpu as pltpu


def _cnn_structured_kernel(x_ref, s_ref,
                           w1_ref, b1_ref, w2_ref, b2_ref,
                           wf1a_ref, wf1b_ref, bf1_ref,
                           wf2_ref, bf2_ref, out_ref, *, L_valid):
    # x_ref  : (Bt, Lp, K1_p) bf16  im2col'ed tokens ([x[l-1] | x[l] | x[l+1]], lane-padded)
    # s_ref  : (Bt, S_p)      bf16  structured features (lane-padded)
    # out_ref: (Bt, NC_p)     f32   logits (lane-dense; padded classes are 0)
    Bt, Lp, K1 = x_ref.shape
    C1 = w1_ref.shape[1]
    C2 = w2_ref.shape[1]
    BL = Bt * Lp

    x = x_ref[...].reshape(BL, K1)                      # bf16 [BL, K1_p]

    # --- conv1 (k=3, pad=1) + ReLU: one MXU matmul, all taps folded via wrapper im2col.
    h1 = jnp.maximum(
        jnp.dot(x, w1_ref[...], preferred_element_type=jnp.float32) + b1_ref[...],
        0.0)                                            # f32 [BL, C1]

    # --- conv2 (k=3, pad=1) + ReLU: in-kernel im2col on h1, single K=3*C1 matmul
    #     (tap accumulation stays inside the MXU: 1 result pop instead of 3,
    #      no f32 output rolls / masks / adds).
    pos = jax.lax.broadcasted_iota(jnp.int32, (BL, 1), 0) % Lp   # position within sample
    # prev tap: row r-1 (zero at l == 0, which also kills cross-sample wraparound)
    prev_f = jnp.where(pos == 0, 0.0, pltpu.roll(h1, shift=1, axis=0))
    # next tap: row r+1 (zero at l == L-1)
    next_f = jnp.where(pos == L_valid - 1, 0.0, pltpu.roll(h1, shift=BL - 1, axis=0))
    x2 = jnp.concatenate([prev_f.astype(jnp.bfloat16),
                          h1.astype(jnp.bfloat16),
                          next_f.astype(jnp.bfloat16)], axis=1)  # bf16 [BL, 3*C1]
    h2 = jnp.maximum(
        jnp.dot(x2, w2_ref[...], preferred_element_type=jnp.float32) + b2_ref[...],
        0.0)                                            # f32 [BL, C2]

    # --- AdaptiveMaxPool1d(1): max over the valid sequence positions of each sample.
    if Lp != L_valid:                                   # mask L-padding rows out of the max
        h2 = jnp.where(pos < L_valid, h2, -jnp.inf)
    pooled = jnp.max(h2.reshape(Bt, Lp, C2), axis=1)    # f32 [Bt, C2]

    # --- fc1 on concat([pooled, structured]) == pooled @ Wa + structured @ Wb
    f1 = (jnp.dot(pooled.astype(jnp.bfloat16), wf1a_ref[...],
                  preferred_element_type=jnp.float32)
          + jnp.dot(s_ref[...], wf1b_ref[...], preferred_element_type=jnp.float32)
          + bf1_ref[...])
    f1 = jnp.maximum(f1, 0.0)
    # Dropout(0.3) is identity at inference (eval mode) -> no-op here.
    out_ref[...] = (jnp.dot(f1.astype(jnp.bfloat16), wf2_ref[...],
                            preferred_element_type=jnp.float32)
                    + bf2_ref[...])


def cnn_with_structured(x_tokens, x_structured, params, *, b_tile=None):
    """x_tokens: [B, C_in, L] (PyTorch NCL), x_structured: [B, S] -> logits [B, NC]."""
    w1, b1, w2, b2, wf1, bf1, wf2, bf2 = params
    B, Cin, L = x_tokens.shape
    S = x_structured.shape[1]
    C1 = w1.shape[0]
    C2 = w2.shape[0]
    H = wf1.shape[0]
    NC = wf2.shape[0]

    LANE = 128
    rup = lambda v, m: ((v + m - 1) // m) * m

    Lp = rup(L, 8)                    # sublane-aligned sequence length (pool-masked in kernel)
    if b_tile is None:
        # Target BL = b_tile*Lp ~ 1024 rows per grid step; don't over-pad small batches;
        # keep >= 2 grid steps when the batch allows so v7x's 2 TCs both get work.
        b_tile = max(8, min(128, (1024 // Lp) // 8 * 8))
        b_tile = min(b_tile, rup(B, 8))
        if B >= 16:
            b_tile = min(b_tile, rup((B + 1) // 2, 8))
        b_tile = max(8, b_tile)
    assert b_tile % 8 == 0 and b_tile >= 8, "b_tile must be a multiple of 8"

    Bp = rup(B, b_tile)
    K1 = 3 * Cin
    K1_p = rup(K1, LANE)              # lane-align conv1 (im2col) contraction dim
    S_p = rup(S, LANE)                # lane-align structured features
    NC_p = rup(NC, LANE)              # lane-dense output store

    # --- Glue (layout plumbing): channels-last, pad L/batch, wrapper-side im2col for conv1.
    x_cl = jnp.transpose(x_tokens, (0, 2, 1)).astype(jnp.float32)     # [B, L, Cin]
    x_cl = jnp.pad(x_cl, ((0, Bp - B), (0, Lp - L), (0, 0)))          # [Bp, Lp, Cin]
    zcol = jnp.zeros((Bp, 1, Cin), x_cl.dtype)
    x_prev = jnp.concatenate([zcol, x_cl[:, :-1, :]], axis=1)         # X[l-1] (zero at l=0)
    x_next = jnp.concatenate([x_cl[:, 1:, :], zcol], axis=1)          # X[l+1] (zero at l=L-1)
    x_im2 = jnp.concatenate([x_prev, x_cl, x_next], axis=2)           # [Bp, Lp, 3*Cin]
    x_im2 = jnp.pad(x_im2, ((0, 0), (0, 0), (0, K1_p - K1))).astype(jnp.bfloat16)

    s_p = jnp.pad(x_structured, ((0, Bp - B), (0, S_p - S))).astype(jnp.bfloat16)

    # Conv weights torch [out, in, k] -> [k, in, out] -> flatten taps into contraction rows.
    w1_m = jnp.pad(jnp.transpose(w1, (2, 1, 0)).reshape(K1, C1),
                   ((0, K1_p - K1), (0, 0))).astype(jnp.bfloat16)     # [K1_p, C1]
    b1_r = b1.reshape(1, C1).astype(jnp.float32)
    w2_m = jnp.transpose(w2, (2, 1, 0)).reshape(3 * C1, C2).astype(jnp.bfloat16)  # [3*C1, C2]
    b2_r = b2.reshape(1, C2).astype(jnp.float32)
    # fc1 weight [H, C2+S]: split rows of W^T into pooled part / structured part.
    wf1_t = jnp.transpose(wf1)                                        # [C2+S, H]
    wf1a = wf1_t[:C2, :].astype(jnp.bfloat16)                         # [C2, H]
    wf1b = jnp.pad(wf1_t[C2:, :], ((0, S_p - S), (0, 0))).astype(jnp.bfloat16)   # [S_p, H]
    bf1_r = bf1.reshape(1, H).astype(jnp.float32)
    wf2_t = jnp.pad(jnp.transpose(wf2), ((0, 0), (0, NC_p - NC))).astype(jnp.bfloat16)  # [H, NC_p]
    bf2_r = jnp.pad(bf2.reshape(1, NC), ((0, 0), (0, NC_p - NC))).astype(jnp.float32)

    kernel = functools.partial(_cnn_structured_kernel, L_valid=L)
    const2 = lambda i: (0, 0)

    out = pl.pallas_call(
        kernel,
        out_shape=jax.ShapeDtypeStruct((Bp, NC_p), jnp.float32),
        grid_spec=pltpu.PrefetchScalarGridSpec(
            num_scalar_prefetch=0,
            grid=(Bp // b_tile,),
            in_specs=[
                pl.BlockSpec((b_tile, Lp, K1_p), lambda i: (i, 0, 0)),   # im2col tokens
                pl.BlockSpec((b_tile, S_p), lambda i: (i, 0)),           # structured
                pl.BlockSpec((K1_p, C1), const2), pl.BlockSpec((1, C1), const2),
                pl.BlockSpec((3 * C1, C2), const2), pl.BlockSpec((1, C2), const2),
                pl.BlockSpec((C2, H), const2), pl.BlockSpec((S_p, H), const2),
                pl.BlockSpec((1, H), const2),
                pl.BlockSpec((H, NC_p), const2), pl.BlockSpec((1, NC_p), const2),
            ],
            out_specs=pl.BlockSpec((b_tile, NC_p), lambda i: (i, 0)),
        ),
        compiler_params=pltpu.CompilerParams(
            dimension_semantics=("parallel",),
            vmem_limit_bytes=32 * 1024 * 1024),
    )(x_im2, s_p, w1_m, b1_r, w2_m, b2_r, wf1a, wf1b, bf1_r, wf2_t, bf2_r)
    # Padded batch rows / padded classes carry garbage/zeros -> slice them away.
    return out[:B, :NC]


def init_params(key, Cin, C1, C2, S, H, NC, k=3):
    """Deterministic PyTorch-style uniform(-1/sqrt(fan_in), 1/sqrt(fan_in)) init."""
    keys = jax.random.split(key, 8)

    def u(kk, shape, fan_in):
        bound = 1.0 / float(fan_in) ** 0.5
        return jax.random.uniform(kk, shape, jnp.float32, -bound, bound)

    w1 = u(keys[0], (C1, Cin, k), Cin * k)
    b1 = u(keys[1], (C1,), Cin * k)
    w2 = u(keys[2], (C2, C1, k), C1 * k)
    b2 = u(keys[3], (C2,), C1 * k)
    wf1 = u(keys[4], (H, C2 + S), C2 + S)
    bf1 = u(keys[5], (H,), C2 + S)
    wf2 = u(keys[6], (NC, H), H)
    bf2 = u(keys[7], (NC,), H)
    return (w1, b1, w2, b2, wf1, bf1, wf2, bf2)


def reference_forward(x_tokens, x_structured, params):
    """Pure-JAX f32 reference matching the PyTorch forward (eval mode)."""
    w1, b1, w2, b2, wf1, bf1, wf2, bf2 = params
    dn = jax.lax.conv_dimension_numbers(x_tokens.shape, w1.shape, ('NCH', 'OIH', 'NCH'))
    h = jax.lax.conv_general_dilated(x_tokens, w1, (1,), ((1, 1),), dimension_numbers=dn)
    h = jax.nn.relu(h + b1[None, :, None])
    dn2 = jax.lax.conv_dimension_numbers(h.shape, w2.shape, ('NCH', 'OIH', 'NCH'))
    h = jax.lax.conv_general_dilated(h, w2, (1,), ((1, 1),), dimension_numbers=dn2)
    h = jax.nn.relu(h + b2[None, :, None])
    pooled = jnp.max(h, axis=2)
    cat = jnp.concatenate([pooled, x_structured], axis=1)
    f1 = jax.nn.relu(cat @ wf1.T + bf1)
    return f1 @ wf2.T + bf2


if __name__ == "__main__":
    # Small shapes consistent with the module (internal widths kept: 256 / 128 / 128).
    B, Cin, L = 2, 32, 16
    S, NC = 14, 4
    C1, C2, H = 256, 128, 128

    key = jax.random.PRNGKey(0)
    k_tok, k_str, k_par = jax.random.split(key, 3)
    x_tokens = jax.random.normal(k_tok, (B, Cin, L), jnp.float32)     # [B, 768->32, 128->16]
    x_structured = jax.random.normal(k_str, (B, S), jnp.float32)      # [B, 14]
    params = init_params(k_par, Cin, C1, C2, S, H, NC)

    logits = jax.block_until_ready(cnn_with_structured(x_tokens, x_structured, params))
    ref = jax.block_until_ready(reference_forward(x_tokens, x_structured, params))

    assert logits.shape == (B, NC)
    # bf16 matmul operands (f32 accumulate) -> looser tolerance than a pure-f32 pipeline.
    assert jnp.allclose(logits, ref, rtol=3e-2, atol=3e-2), (logits, ref)
    print("KERNEL_OK")
</pallas_src>

<mosaic_0001>
module attributes {stable_mosaic.version = 11 : i64} {
  func.func @_cnn_structured_kernel(%arg0: i32, %arg1: memref<8x16x128xbf16, #tpu.memory_space<vmem>>, %arg2: memref<8x128xbf16, #tpu.memory_space<vmem>>, %arg3: memref<128x256xbf16, #tpu.memory_space<vmem>>, %arg4: memref<1x256xf32, #tpu.memory_space<vmem>>, %arg5: memref<768x128xbf16, #tpu.memory_space<vmem>>, %arg6: memref<1x128xf32, #tpu.memory_space<vmem>>, %arg7: memref<128x128xbf16, #tpu.memory_space<vmem>>, %arg8: memref<128x128xbf16, #tpu.memory_space<vmem>>, %arg9: memref<1x128xf32, #tpu.memory_space<vmem>>, %arg10: memref<128x128xbf16, #tpu.memory_space<vmem>>, %arg11: memref<1x128xf32, #tpu.memory_space<vmem>>, %arg12: memref<8x128xf32, #tpu.memory_space<vmem>>) attributes {dimension_semantics = [#tpu.dimension_semantics<parallel>], iteration_bounds = array<i64: 1>, scalar_prefetch = 0 : i64, scratch_operands = 0 : i64, tpu.core_type = #tpu.core_type<tc>, window_params = [{transform_indices = @transform_0, window_bounds = array<i64: 8, 16, 128>}, {transform_indices = @transform_1, window_bounds = array<i64: 8, 128>}, {pipeline_mode = #tpu.pipeline_mode<synchronous>, transform_indices = @transform_2, window_bounds = array<i64: 128, 256>}, {pipeline_mode = #tpu.pipeline_mode<synchronous>, transform_indices = @transform_3, window_bounds = array<i64: 1, 256>}, {pipeline_mode = #tpu.pipeline_mode<synchronous>, transform_indices = @transform_4, window_bounds = array<i64: 768, 128>}, {pipeline_mode = #tpu.pipeline_mode<synchronous>, transform_indices = @transform_5, window_bounds = array<i64: 1, 128>}, {pipeline_mode = #tpu.pipeline_mode<synchronous>, transform_indices = @transform_6, window_bounds = array<i64: 128, 128>}, {pipeline_mode = #tpu.pipeline_mode<synchronous>, transform_indices = @transform_7, window_bounds = array<i64: 128, 128>}, {pipeline_mode = #tpu.pipeline_mode<synchronous>, transform_indices = @transform_8, window_bounds = array<i64: 1, 128>}, {pipeline_mode = #tpu.pipeline_mode<synchronous>, transform_indices = @transform_9, window_bounds = array<i64: 128, 128>}, {pipeline_mode = #tpu.pipeline_mode<synchronous>, transform_indices = @transform_10, window_bounds = array<i64: 1, 128>}, {transform_indices = @transform_11, window_bounds = array<i64: 8, 128>}]} {
    %c0 = arith.constant 0 : index
    %c0_0 = arith.constant 0 : index
    %c0_1 = arith.constant 0 : index
    %0 = vector.load %arg1[%c0, %c0_0, %c0_1] : memref<8x16x128xbf16, #tpu.memory_space<vmem>>, vector<8x16x128xbf16>
    %1 = vector.shape_cast %0 : vector<8x16x128xbf16> to vector<128x128xbf16>
    %c0_2 = arith.constant 0 : index
    %c0_3 = arith.constant 0 : index
    %2 = vector.load %arg3[%c0_2, %c0_3] : memref<128x256xbf16, #tpu.memory_space<vmem>>, vector<128x256xbf16>
    %cst = arith.constant dense<0.000000e+00> : vector<128x256xf32>
    %3 = tpu.matmul %1, %2, %cst {dimension_numbers = #tpu.dot_dimension_numbers<[1], [0], [0], [1], [0, 0, 1, 1], [], []>} : vector<128x128xbf16>, vector<128x256xbf16>, vector<128x256xf32> -> vector<128x256xf32>
    %c0_4 = arith.constant 0 : index
    %c0_5 = arith.constant 0 : index
    %4 = vector.load %arg4[%c0_4, %c0_5] : memref<1x256xf32, #tpu.memory_space<vmem>>, vector<1x256xf32>
    %5 = vector.broadcast %4 : vector<1x256xf32> to vector<128x256xf32>
    %6 = arith.addf %3, %5 : vector<128x256xf32>
    %cst_6 = arith.constant 0.000000e+00 : f32
    %7 = vector.broadcast %cst_6 : f32 to vector<128x256xf32>
    %8 = arith.maximumf %6, %7 : vector<128x256xf32>
    %9 = tpu.iota {dimensions = array<i32: 0>} : vector<128x1xi32>
    %c16_i32 = arith.constant 16 : i32
    %c0_i32 = arith.constant 0 : i32
    %10 = arith.cmpi eq, %c16_i32, %c0_i32 : i32
    %c1_i32 = arith.constant 1 : i32
    %11 = arith.select %10, %c1_i32, %c16_i32 : i32
    %12 = vector.broadcast %11 : i32 to vector<128x1xi32>
    %13 = arith.remsi %9, %12 : vector<128x1xi32>
    %c0_i32_7 = arith.constant 0 : i32
    %14 = vector.broadcast %c0_i32_7 : i32 to vector<128x1xi32>
    %15 = arith.cmpi ne, %13, %14 : vector<128x1xi32>
    %c0_i32_8 = arith.constant 0 : i32
    %16 = vector.broadcast %c0_i32_8 : i32 to vector<128x1xi32>
    %17 = arith.cmpi slt, %13, %16 : vector<128x1xi32>
    %c0_i32_9 = arith.constant 0 : i32
    %18 = arith.cmpi slt, %11, %c0_i32_9 : i32
    %19 = vector.broadcast %18 : i1 to vector<128x1xi1>
    %20 = vector.broadcast %19 : vector<128x1xi1> to vector<128x1xi1>
    %21 = arith.xori %17, %20 : vector<128x1xi1>
    %22 = arith.andi %21, %15 : vector<128x1xi1>
    %23 = vector.broadcast %11 : i32 to vector<128x1xi32>
    %24 = arith.addi %13, %23 : vector<128x1xi32>
    %25 = arith.select %22, %24, %13 : vector<128x1xi1>, vector<128x1xi32>
    %c0_i32_10 = arith.constant 0 : i32
    %26 = vector.broadcast %c0_i32_10 : i32 to vector<128x1xi32>
    %27 = arith.cmpi eq, %25, %26 : vector<128x1xi32>
    %c1_i32_11 = arith.constant 1 : i32
    %28 = tpu.dynamic_rotate %8 by %c1_i32_11 dim 0 : vector<128x256xf32>, i32 -> vector<128x256xf32>
    %cst_12 = arith.constant 0.000000e+00 : f32
    %29 = vector.shape_cast %27 : vector<128x1xi1> to vector<128x1xi1>
    %30 = vector.broadcast %29 : vector<128x1xi1> to vector<128x256xi1>
    %31 = vector.broadcast %cst_12 : f32 to vector<128x256xf32>
    %32 = arith.select %30, %31, %28 : vector<128x256xi1>, vector<128x256xf32>
    %c15_i32 = arith.constant 15 : i32
    %33 = vector.broadcast %c15_i32 : i32 to vector<128x1xi32>
    %34 = arith.cmpi eq, %25, %33 : vector<128x1xi32>
    %c127_i32 = arith.constant 127 : i32
    %35 = tpu.dynamic_rotate %8 by %c127_i32 dim 0 : vector<128x256xf32>, i32 -> vector<128x256xf32>
    %cst_13 = arith.constant 0.000000e+00 : f32
    %36 = vector.shape_cast %34 : vector<128x1xi1> to vector<128x1xi1>
    %37 = vector.broadcast %36 : vector<128x1xi1> to vector<128x256xi1>
    %38 = vector.broadcast %cst_13 : f32 to vector<128x256xf32>
    %39 = arith.select %37, %38, %35 : vector<128x256xi1>, vector<128x256xf32>
    %40 = arith.truncf %32 : vector<128x256xf32> to vector<128x256xbf16>
    %41 = arith.truncf %8 : vector<128x256xf32> to vector<128x256xbf16>
    %42 = arith.truncf %39 : vector<128x256xf32> to vector<128x256xbf16>
    %43 = tpu.concatenate %40, %41, %42 in 1 : vector<128x256xbf16>, vector<128x256xbf16>, vector<128x256xbf16> -> vector<128x768xbf16>
    %c0_14 = arith.constant 0 : index
    %c0_15 = arith.constant 0 : index
    %44 = vector.load %arg5[%c0_14, %c0_15] : memref<768x128xbf16, #tpu.memory_space<vmem>>, vector<768x128xbf16>
    %cst_16 = arith.constant dense<0.000000e+00> : vector<128x128xf32>
    %45 = tpu.matmul %43, %44, %cst_16 {dimension_numbers = #tpu.dot_dimension_numbers<[1], [0], [0], [1], [0, 0, 1, 1], [], []>} : vector<128x768xbf16>, vector<768x128xbf16>, vector<128x128xf32> -> vector<128x128xf32>
    %c0_17 = arith.constant 0 : index
    %c0_18 = arith.constant 0 : index
    %46 = vector.load %arg6[%c0_17, %c0_18] : memref<1x128xf32, #tpu.memory_space<vmem>>, vector<1x128xf32>
    %47 = vector.broadcast %46 : vector<1x128xf32> to vector<128x128xf32>
    %48 = arith.addf %45, %47 : vector<128x128xf32>
    %cst_19 = arith.constant 0.000000e+00 : f32
    %49 = vector.broadcast %cst_19 : f32 to vector<128x128xf32>
    %50 = arith.maximumf %48, %49 : vector<128x128xf32>
    %51 = vector.shape_cast %50 : vector<128x128xf32> to vector<8x16x128xf32>
    %cst_20 = arith.constant dense<0xFF800000> : vector<8x128xf32>
    %52 = vector.multi_reduction <maximumf>, %51, %cst_20 [1] : vector<8x16x128xf32> to vector<8x128xf32>
    %53 = arith.truncf %52 : vector<8x128xf32> to vector<8x128xbf16>
    %c0_21 = arith.constant 0 : index
    %c0_22 = arith.constant 0 : index
    %54 = vector.load %arg7[%c0_21, %c0_22] : memref<128x128xbf16, #tpu.memory_space<vmem>>, vector<128x128xbf16>
    %cst_23 = arith.constant dense<0.000000e+00> : vector<8x128xf32>
    %55 = tpu.matmul %53, %54, %cst_23 {dimension_numbers = #tpu.dot_dimension_numbers<[1], [0], [0], [1], [0, 0, 1, 1], [], []>} : vector<8x128xbf16>, vector<128x128xbf16>, vector<8x128xf32> -> vector<8x128xf32>
    %c0_24 = arith.constant 0 : index
    %c0_25 = arith.constant 0 : index
    %56 = vector.load %arg2[%c0_24, %c0_25] : memref<8x128xbf16, #tpu.memory_space<vmem>>, vector<8x128xbf16>
    %c0_26 = arith.constant 0 : index
    %c0_27 = arith.constant 0 : index
    %57 = vector.load %arg8[%c0_26, %c0_27] : memref<128x128xbf16, #tpu.memory_space<vmem>>, vector<128x128xbf16>
    %cst_28 = arith.constant dense<0.000000e+00> : vector<8x128xf32>
    %58 = tpu.matmul %56, %57, %cst_28 {dimension_numbers = #tpu.dot_dimension_numbers<[1], [0], [0], [1], [0, 0, 1, 1], [], []>} : vector<8x128xbf16>, vector<128x128xbf16>, vector<8x128xf32> -> vector<8x128xf32>
    %59 = arith.addf %55, %58 : vector<8x128xf32>
    %c0_29 = arith.constant 0 : index
    %c0_30 = arith.constant 0 : index
    %60 = vector.load %arg9[%c0_29, %c0_30] : memref<1x128xf32, #tpu.memory_space<vmem>>, vector<1x128xf32>
    %61 = vector.broadcast %60 : vector<1x128xf32> to vector<8x128xf32>
    %62 = arith.addf %59, %61 : vector<8x128xf32>
    %cst_31 = arith.constant 0.000000e+00 : f32
    %63 = vector.broadcast %cst_31 : f32 to vector<8x128xf32>
    %64 = arith.maximumf %62, %63 : vector<8x128xf32>
    %65 = arith.truncf %64 : vector<8x128xf32> to vector<8x128xbf16>
    %c0_32 = arith.constant 0 : index
    %c0_33 = arith.constant 0 : index
    %66 = vector.load %arg10[%c0_32, %c0_33] : memref<128x128xbf16, #tpu.memory_space<vmem>>, vector<128x128xbf16>
    %cst_34 = arith.constant dense<0.000000e+00> : vector<8x128xf32>
    %67 = tpu.matmul %65, %66, %cst_34 {dimension_numbers = #tpu.dot_dimension_numbers<[1], [0], [0], [1], [0, 0, 1, 1], [], []>} : vector<8x128xbf16>, vector<128x128xbf16>, vector<8x128xf32> -> vector<8x128xf32>
    %c0_35 = arith.constant 0 : index
    %c0_36 = arith.constant 0 : index
    %68 = vector.load %arg11[%c0_35, %c0_36] : memref<1x128xf32, #tpu.memory_space<vmem>>, vector<1x128xf32>
    %69 = vector.broadcast %68 : vector<1x128xf32> to vector<8x128xf32>
    %70 = arith.addf %67, %69 : vector<8x128xf32>
    %c0_37 = arith.constant 0 : index
    %c0_38 = arith.constant 0 : index
    %71 = vector.load %arg12[%c0_37, %c0_38] : memref<8x128xf32, #tpu.memory_space<vmem>>, vector<8x128xf32>
    tpu.vector_store %arg12[%c0_37, %c0_38], %70 {strides = array<i32>} : memref<8x128xf32, #tpu.memory_space<vmem>>, vector<8x128xf32>,
    return
  }
  func.func @transform_0(%arg0: i32) -> (i32, i32, i32) {
    %c0_i32 = arith.constant 0 : i32
    %c0_i32_0 = arith.constant 0 : i32
    %c0_i32_1 = arith.constant 0 : i32
    return %arg0, %c0_i32, %c0_i32_0 : i32, i32, i32
  }
  func.func @transform_1(%arg0: i32) -> (i32, i32) {
    %c0_i32 = arith.constant 0 : i32
    %c0_i32_0 = arith.constant 0 : i32
    return %arg0, %c0_i32 : i32, i32
  }
  func.func @transform_2(%arg0: i32) -> (i32, i32) {
    %c0_i32 = arith.constant 0 : i32
    %c0_i32_0 = arith.constant 0 : i32
    %c0_i32_1 = arith.constant 0 : i32
    return %c0_i32, %c0_i32_0 : i32, i32
  }
  func.func @transform_3(%arg0: i32) -> (i32, i32) {
    %c0_i32 = arith.constant 0 : i32
    %c0_i32_0 = arith.constant 0 : i32
    %c0_i32_1 = arith.constant 0 : i32
    return %c0_i32, %c0_i32_0 : i32, i32
  }
  func.func @transform_4(%arg0: i32) -> (i32, i32) {
    %c0_i32 = arith.constant 0 : i32
    %c0_i32_0 = arith.constant 0 : i32
    %c0_i32_1 = arith.constant 0 : i32
    return %c0_i32, %c0_i32_0 : i32, i32
  }
  func.func @transform_5(%arg0: i32) -> (i32, i32) {
    %c0_i32 = arith.constant 0 : i32
    %c0_i32_0 = arith.constant 0 : i32
    %c0_i32_1 = arith.constant 0 : i32
    return %c0_i32, %c0_i32_0 : i32, i32
  }
  func.func @transform_6(%arg0: i32) -> (i32, i32) {
    %c0_i32 = arith.constant 0 : i32
    %c0_i32_0 = arith.constant 0 : i32
    %c0_i32_1 = arith.constant 0 : i32
    return %c0_i32, %c0_i32_0 : i32, i32
  }
  func.func @transform_7(%arg0: i32) -> (i32, i32) {
    %c0_i32 = arith.constant 0 : i32
    %c0_i32_0 = arith.constant 0 : i32
    %c0_i32_1 = arith.constant 0 : i32
    return %c0_i32, %c0_i32_0 : i32, i32
  }
  func.func @transform_8(%arg0: i32) -> (i32, i32) {
    %c0_i32 = arith.constant 0 : i32
    %c0_i32_0 = arith.constant 0 : i32
    %c0_i32_1 = arith.constant 0 : i32
    return %c0_i32, %c0_i32_0 : i32, i32
  }
  func.func @transform_9(%arg0: i32) -> (i32, i32) {
    %c0_i32 = arith.constant 0 : i32
    %c0_i32_0 = arith.constant 0 : i32
    %c0_i32_1 = arith.constant 0 : i32
    return %c0_i32, %c0_i32_0 : i32, i32
  }
  func.func @transform_10(%arg0: i32) -> (i32, i32) {
    %c0_i32 = arith.constant 0 : i32
    %c0_i32_0 = arith.constant 0 : i32
    %c0_i32_1 = arith.constant 0 : i32
    return %c0_i32, %c0_i32_0 : i32, i32
  }
  func.func @transform_11(%arg0: i32) -> (i32, i32) {
    %c0_i32 = arith.constant 0 : i32
    %c0_i32_0 = arith.constant 0 : i32
    return %arg0, %c0_i32 : i32, i32
  }
}

</mosaic_0001>

<bundles_post_ra>
// kernel: tpu_custom_call.1
= control target key start
LH: loop header
LB: loop body
LE: loop exit
PB: predicated region body
PF: predicated region fallthrough
CT: control target
= control target key end

     0   :  { %16 = vsyncpa [#allocation3], 0  ;;  %s3704_s0 = inlined_call_operand.hbm [shape: bf16[8,16,128], index: 0, kind: input, shape index: {}]   ;;  %s3705_s1 = inlined_call_operand.hbm [shape: bf16[8,128], index: 1, kind: input, shape index: {}]   ;;  %s3706_s2 = inlined_call_operand.hbm [shape: bf16[128,256], index: 2, kind: input, shape index: {}]   ;;  %s3707_s3 = inlined_call_operand.vmem [shape: f32[1,256], index: 3, kind: input, shape index: {}]   ;;  %s3708_s4 = inlined_call_operand.hbm [shape: bf16[768,128], index: 4, kind: input, shape index: {}]   ;;  %s3709_s5 = inlined_call_operand.vmem [shape: f32[1,128], index: 5, kind: input, shape index: {}]   ;;  %s3710_s6 = inlined_call_operand.hbm [shape: bf16[128,128], index: 6, kind: input, shape index: {}]   ;;  %s3711_s7 = inlined_call_operand.hbm [shape: bf16[128,128], index: 7, kind: input, shape index: {}]   ;;  %s3712_s8 = inlined_call_operand.vmem [shape: f32[1,128], index: 8, kind: input, shape index: {}]   ;;  %s3713_s9 = inlined_call_operand.hbm [shape: bf16[128,128], index: 9, kind: input, shape index: {}]   ;;  %s3714_s10 = inlined_call_operand.vmem [shape: f32[1,128], index: 10, kind: input, shape index: {}]   ;;  %s3715_s11 = inlined_call_operand.hbm [shape: f32[8,128], index: 11, kind: output, shape index: {}]  }
   0x1   :  { %17 = vsyncpa [#allocation6], 0 }
   0x2   :  { %18 = vsyncpa [#allocation9], 0 }
   0x3   :  { %19 = vsyncpa [#allocation12], 0  ;;  %s39_s19 = sshll.u32 %s3705_s1, 4  ;;  %s40_s19 = int_to_ptr.hbm [resolvable:$true] %s39_s19 }
   0x4   :  { %20 = vsyncpa [#allocation4], 0  ;;  %s2984_s20 = smov [#allocation5]   ;;  %s64_s24 = sshll.u32 %s3708_s4, 4  ;;  %s65_s24 = int_to_ptr.hbm [resolvable:$true] %s64_s24 }
   0x5   :  { %s41_s21 = sshll.u32 %s2984_s20, 4  ;;  %s2985_s25 = smov [#allocation8]   ;;  %s42_s21 = int_to_ptr.vmem [resolvable:$true] %s41_s21 }
   0x6   :  { %44 = dma.hbm_to_vmem [thread:$0]  %s40_s19, 64, %s42_s21, [#allocation6]  }
   0x7   :  { %s66_s26 = sshll.u32 %s2985_s25, 4  ;;  %s92_s29 = sshll.u32 %s3711_s7, 4  ;;  %s67_s26 = int_to_ptr.vmem [resolvable:$true] %s66_s26  ;;  %s93_s29 = int_to_ptr.hbm [resolvable:$true] %s92_s29 }
   0x8   :  { %s2986_s1 = smov 64   ;;  %s2987_s30 = smov 4  }
   0x9   :  { %72 = dma.hbm_to_vmem [thread:$0]  %s65_s24, 6144, %s67_s26, [#allocation9], %s2986_s1, %s2986_s1, %s2987_s30  }
   0xa   :  { %s25_s14 = sshll.u32 %s3704_s0, 4  ;;  %s2988_s4 = smov [#allocation11]   ;;  %s26_s14 = int_to_ptr.hbm [resolvable:$true] %s25_s14 }
   0xb   :  { %s94_s15 = sshll.u32 %s2988_s4, 4  ;;  %s2989_s7 = smov [#allocation2]   ;;  %s95_s15 = int_to_ptr.vmem [resolvable:$true] %s94_s15 }
   0xc   :  { %100 = dma.hbm_to_vmem [thread:$0]  %s93_s29, 1024, %s95_s15, [#allocation12], %s2986_s1, %s2986_s1, %s2987_s30  }
   0xd   :  { %s27_s16 = sshll.u32 %s2989_s7, 4  ;;  %s49_s19 = sshll.u32 %s3706_s2, 4  ;;  %s28_s16 = int_to_ptr.vmem [resolvable:$true] %s27_s16  ;;  %s50_s19 = int_to_ptr.hbm [resolvable:$true] %s49_s19 }
   0xe   :  { %33 = dma.hbm_to_vmem [thread:$0]  %s26_s14, 1024, %s28_s16, [#allocation3], %s2986_s1, %s2986_s1, %s2987_s30  }
   0xf   :  { %s2990_s0 = smov [#allocation7]   ;;  %s79_s23 = sshll.u32 %s3710_s6, 4  ;;  %s80_s23 = int_to_ptr.hbm [resolvable:$true] %s79_s23 }
  0x10   :  { %s51_s20 = sshll.u32 %s2990_s0, 4  ;;  %s2991_s24 = smov 128   ;;  %s52_s20 = int_to_ptr.vmem [resolvable:$true] %s51_s20 }
  0x11   :  { %s2992_s25 = smov 8   ;;  %s2993_s26 = smov [#allocation10]  }
  0x12   :  { %57 = dma.hbm_to_vmem [thread:$0]  %s50_s19, 2048, %s52_s20, [#allocation6], %s2991_s24, %s2991_s24, %s2992_s25  }
  0x13   :  { %s81_s27 = sshll.u32 %s2993_s26, 4  ;;  %s107_s29 = sshll.u32 %s3713_s9, 4  ;;  %s82_s27 = int_to_ptr.vmem [resolvable:$true] %s81_s27  ;;  %s108_s29 = int_to_ptr.hbm [resolvable:$true] %s107_s29 }
  0x14   :  { %87 = dma.hbm_to_vmem [thread:$0]  %s80_s23, 1024, %s82_s27, [#allocation9], %s2986_s1, %s2986_s1, %s2987_s30  }
  0x15   :  { %s2994_s12 = smov [#allocation13]  }
  0x16   :  { %s109_s13 = sshll.u32 %s2994_s12, 4  ;;  %s110_s13 = int_to_ptr.vmem [resolvable:$true] %s109_s13 }
  0x17   :  { %115 = dma.hbm_to_vmem [thread:$0]  %s108_s29, 1024, %s110_s13, [#allocation12], %s2986_s1, %s2986_s1, %s2987_s30  }
  0x18   :  { %2974 = dma.done.wait [#allocation3], 1024  }
  0x19   :  { %2975 = vsyncadd [#allocation3], 4294966272 }
  0x1a   :  { %2976 = dma.done.wait [#allocation6], 2112  }
  0x1b   :  { %2977 = vsyncadd [#allocation6], 4294965184 }
  0x1c   :  { %2978 = dma.done.wait [#allocation9], 7168  }
  0x1d   :  { %2979 = vsyncadd [#allocation9], 4294960128 }
  0x1e   :  { %2980 = dma.done.wait [#allocation12], 2048  }
  0x1f   :  { %2981 = vsyncadd [#allocation12], 4294965248  ;;  %v2377_v0 = vld [vmem:[#allocation7 + $0x70] sm:$0xf]  ;;  %v2694_v1 = vld [vmem:[#allocation7 + $0x74] sm:$0xf0] }
  0x20   :  { %v2693_v2 = vld [vmem:[#allocation7 + $0x74] sm:$0xf]  ;;  %v2378_v3 = vor.u32 %v2694_v1, %v2377_v0  ;;  %v2379_v4 = vld [vmem:[#allocation7 + $0x78] sm:$0xf0]  ;;  %v2369_v5 = vld [vmem:[#allocation7 + $0x60] sm:$0xf] }
  0x21   :  { %v2692_v6 = vld [vmem:[#allocation7 + $0x64] sm:$0xf0]  ;;  %v2382_v7 = vor.u32 %v2693_v2, %v2379_v4  ;;  %v2691_v8 = vld [vmem:[#allocation7 + $0x64] sm:$0xf]  ;;  %v2371_v9 = vld [vmem:[#allocation7 + $0x68] sm:$0xf0] }
  0x22   :  { %312 = vmatpush.bf16.msra.mxu0 %v2378_v3  ;;  %v2370_v10 = vor.u32 %v2692_v6, %v2369_v5  ;;  %v2374_v11 = vor.u32 %v2691_v8, %v2371_v9  ;;  %v2361_v12 = vld [vmem:[#allocation7 + $0x50] sm:$0xf]  ;;  %v2690_v13 = vld [vmem:[#allocation7 + $0x54] sm:$0xf0]  ;;  %v2689_v14 = vld [vmem:[#allocation7 + $0x54] sm:$0xf] }
  0x23   :  { %361 = vmatpush.bf16.msra.mxu1 %v2382_v7  ;;  %v2363_v15 = vld [vmem:[#allocation7 + $0x58] sm:$0xf0]  ;;  %v2362_v16 = vor.u32 %v2690_v13, %v2361_v12  ;;  %v2353_v18 = vld [vmem:[#allocation7 + $0x40] sm:$0xf]  ;;  %v2688_v19 = vld [vmem:[#allocation7 + $0x44] sm:$0xf0] }
  0x24   :  { %v2366_v17 = vor.u32 %v2689_v14, %v2363_v15  ;;  %v2687_v20 = vld [vmem:[#allocation7 + $0x44] sm:$0xf]  ;;  %v2355_v21 = vld [vmem:[#allocation7 + $0x48] sm:$0xf0]  ;;  %v2354_v22 = vor.u32 %v2688_v19, %v2353_v18  ;;  %v2345_v24 = vld [vmem:[#allocation7 + $0x30] sm:$0xf]  ;;  %v442_v15 = vlaneseq }
  0x25   :  { %v2358_v23 = vor.u32 %v2687_v20, %v2355_v21  ;;  %v2686_v25 = vld [vmem:[#allocation7 + $0x34] sm:$0xf0]  ;;  %v2685_v26 = vld [vmem:[#allocation7 + $0x34] sm:$0xf]  ;;  %v2347_v27 = vld [vmem:[#allocation7 + $0x38] sm:$0xf0] }
  0x26   :  { %313 = vmatpush.bf16.msra.mxu0 %v2370_v10  ;;  %v2346_v28 = vor.u32 %v2686_v25, %v2345_v24  ;;  %v2350_v29 = vor.u32 %v2685_v26, %v2347_v27  ;;  %v2337_v30 = vld [vmem:[#allocation7 + $0x20] sm:$0xf]  ;;  %v2684_v31 = vld [vmem:[#allocation7 + $0x24] sm:$0xf0]  ;;  %v2683_v32 = vld [vmem:[#allocation7 + $0x24] sm:$0xf] }
  0x27   :  { %362 = vmatpush.bf16.msra.mxu1 %v2374_v11  ;;  %v2339_v33 = vld [vmem:[#allocation7 + $0x28] sm:$0xf0]  ;;  %v2338_v34 = vor.u32 %v2684_v31, %v2337_v30  ;;  %v2329_v36 = vld [vmem:[#allocation7 + $0x10] sm:$0xf]  ;;  %v2682_v37 = vld [vmem:[#allocation7 + $0x14] sm:$0xf0] }
  0x28   :  { %v2342_v35 = vor.u32 %v2683_v32, %v2339_v33  ;;  %v2681_v38 = vld [vmem:[#allocation7 + $0x14] sm:$0xf]  ;;  %v2331_v39 = vld [vmem:[#allocation7 + $0x18] sm:$0xf0]  ;;  %v2330_v40 = vor.u32 %v2682_v37, %v2329_v36  ;;  %v2321_v42 = vld [vmem:[#allocation7] sm:$0xf] }
  0x29   :  { %v2334_v41 = vor.u32 %v2681_v38, %v2331_v39  ;;  %v2680_v43 = vld [vmem:[#allocation7 + $0x4] sm:$0xf0]  ;;  %v2679_v44 = vld [vmem:[#allocation7 + $0x4] sm:$0xf]  ;;  %v2323_v45 = vld [vmem:[#allocation7 + $0x8] sm:$0xf0] }
  0x2a   :  { %314 = vmatpush.bf16.msra.mxu0 %v2362_v16  ;;  %v2322_v46 = vor.u32 %v2680_v43, %v2321_v42  ;;  %v2326_v47 = vor.u32 %v2679_v44, %v2323_v45  ;;  %v2671_v48 = vld [vmem:[#allocation2] sm:$0xff]  ;;  %v2672_v49 = vld [vmem:[#allocation2 + $0x8] sm:$0xff]  ;;  %v2673_v50 = vld [vmem:[#allocation2 + $0x10] sm:$0xff]  ;;  %v3105_v18 = vshrl.u32 %v442_v15, 7  ;;  %s2995_s15 = smov [#allocation14]   ;;  %s2274_s18 = sshll.u32 %s3715_s11, 4  ;;  %s2275_s18 = int_to_ptr.hbm [resolvable:$true] %s2274_s18 }
  0x2b   :  { %363 = vmatpush.bf16.msra.mxu1 %v2366_v17  ;;  %v2674_v51 = vld [vmem:[#allocation2 + $0x18] sm:$0xff]  ;;  %v2675_v52 = vld [vmem:[#allocation2 + $0x20] sm:$0xff]  ;;  %v2676_v53 = vld [vmem:[#allocation2 + $0x28] sm:$0xff]  ;;  %s2272_s7 = sshll.u32 %s2995_s15, 4  ;;  %s2273_s7 = int_to_ptr.vmem [resolvable:$true] %s2272_s7 }
  0x2c   :  { %v2718_v54 = vld [vmem:[#allocation8 + $0xb8] sm:$0xff]  ;;  %v2717_v56 = vld [vmem:[#allocation8 + $0xb0] sm:$0xff]  ;;  %v2716_v58 = vld [vmem:[#allocation8 + $0xa8] sm:$0xff]  ;;  %vm699_vm0 = vcmp.lt.s32.totalorder %v3105_v18, 1  ;;  %vm844_vm1 = vcmp.lt.s32.totalorder %v3105_v18, 7  ;;  %v445_v27 = vadd.s32 16, %v3105_v18 }
  0x2d   :  { %v2726_v55 = vld [vmem:[#allocation8 + $0xf8] sm:$0xff]  ;;  %v2725_v57 = vld [vmem:[#allocation8 + $0xf0] sm:$0xff]  ;;  %v2724_v59 = vld [vmem:[#allocation8 + $0xe8] sm:$0xff] }
  0x2e   :  { %315 = vmatpush.bf16.msra.mxu0 %v2354_v22  ;;  %v2677_v60 = vld [vmem:[#allocation2 + $0x30] sm:$0xff]  ;;  %v2715_v61 = vld [vmem:[#allocation8 + $0xa0] sm:$0xff]  ;;  %v2714_v63 = vld [vmem:[#allocation8 + $0x98] sm:$0xff] }
  0x2f   :  { %364 = vmatpush.bf16.msra.mxu1 %v2358_v23  ;;  %v2723_v62 = vld [vmem:[#allocation8 + $0xe0] sm:$0xff]  ;;  %v2722_v0 = vld [vmem:[#allocation8 + $0xd8] sm:$0xff]  ;;  %v2713_v1 = vld [vmem:[#allocation8 + $0x90] sm:$0xff] }
  0x30   :  { %v2721_v2 = vld [vmem:[#allocation8 + $0xd0] sm:$0xff]  ;;  %v2712_v3 = vld [vmem:[#allocation8 + $0x88] sm:$0xff]  ;;  %v2711_v6 = vld [vmem:[#allocation8 + $0x80] sm:$0xff] }
  0x31   :  { %v2720_v4 = vld [vmem:[#allocation8 + $0xc8] sm:$0xff]  ;;  %v2678_v5 = vld [vmem:[#allocation2 + $0x38] sm:$0xff]  ;;  %v2719_v7 = vld [vmem:[#allocation8 + $0xc0] sm:$0xff] }
  0x32   :  { %316 = vmatpush.bf16.msra.mxu0 %v2346_v28  ;;  %v178_v8 = vld [vmem:[%s3707_s3] sm:$0x3]  ;;  %v444_v28 = vadd.s32 8, %v3105_v18 }
  0x33   :  { %365 = vmatpush.bf16.msra.mxu1 %v2350_v29  ;;  %v3095_v9 = vperm.slane %v178_v8, 0  ;;  %v3097_v10 = vperm.slane %v178_v8, 1 }
  0x36   :  { %317 = vmatpush.bf16.msra.mxu0 %v2338_v34 }
  0x37   :  { %366 = vmatpush.bf16.msra.mxu1 %v2342_v35 }
  0x3a   :  { %318 = vmatpush.bf16.msra.mxu0 %v2330_v40 }
  0x3b   :  { %367 = vmatpush.bf16.msra.mxu1 %v2334_v41 }
  0x3e   :  { %319 = vmatpush.bf16.msra.mxu0 %v2322_v46 }
  0x3f   :  { %368 = vmatpush.bf16.msra.mxu1 %v2326_v47 }
  0x41   :  { %320 = vmatmul.bf16.vlgmr.msra.gmra.mxu0 %v2671_v48 }
  0x42   :  { %369 = vmatmul.bf16.vlgmr.msra.gmra.mxu1 %v2671_v48  ;;  %1715 = vmatpush.bf16.msrb.mxu0 %v2718_v54 }
  0x43   :  { %1764 = vmatpush.bf16.msrb.mxu1 %v2726_v55  ;;  %v470_v55 = vand.u32 15, %v444_v28 }
  0x45   :  { %vm3146_vm3 = vcmp.eq.s32.totalorder %v470_v55, 15 }
  0x46   :  { %1716 = vmatpush.bf16.msrb.mxu0 %v2717_v56 }
  0x47   :  { %1765 = vmatpush.bf16.msrb.mxu1 %v2725_v57 }
  0x4a   :  { %1717 = vmatpush.bf16.msrb.mxu0 %v2716_v58 }
  0x4b   :  { %1766 = vmatpush.bf16.msrb.mxu1 %v2724_v59 }
  0x4e   :  { %1718 = vmatpush.bf16.msrb.mxu0 %v2715_v61 }
  0x4f   :  { %1767 = vmatpush.bf16.msrb.mxu1 %v2723_v62 }
  0x51   :  { %325 = vmatmul.bf16.gmra.mxu0 %v2672_v49 }
  0x52   :  { %374 = vmatmul.bf16.gmra.mxu1 %v2672_v49  ;;  %1719 = vmatpush.bf16.msrb.mxu0 %v2714_v63  ;;  %v477_v49 = vand.u32 15, %v445_v27  ;;  %v447_v63 = vadd.s32 32, %v3105_v18 }
  0x53   :  { %1768 = vmatpush.bf16.msrb.mxu1 %v2722_v0 }
  0x54   :  { %vm3139_vm2 = vcmp.eq.s32.totalorder %v477_v49, 0 }
  0x56   :  { %1720 = vmatpush.bf16.msrb.mxu0 %v2713_v1 }
  0x57   :  { %1769 = vmatpush.bf16.msrb.mxu1 %v2721_v2 }
  0x5a   :  { %1721 = vmatpush.bf16.msrb.mxu0 %v2712_v3 }
  0x5b   :  { %1770 = vmatpush.bf16.msrb.mxu1 %v2720_v4 }
  0x5e   :  { %1722 = vmatpush.bf16.msrb.mxu0 %v2711_v6 }
  0x5f   :  { %1771 = vmatpush.bf16.msrb.mxu1 %v2719_v7 }
  0x61   :  { %330 = vmatmul.bf16.gmra.mxu0 %v2673_v50 }
  0x62   :  { %379 = vmatmul.bf16.gmra.mxu1 %v2673_v50 }
  0x71   :  { %335 = vmatmul.bf16.gmra.mxu0 %v2674_v51 }
  0x72   :  { %384 = vmatmul.bf16.gmra.mxu1 %v2674_v51 }
  0x81   :  { %340 = vmatmul.bf16.gmra.mxu0 %v2675_v52 }
  0x82   :  { %389 = vmatmul.bf16.gmra.mxu1 %v2675_v52 }
  0x91   :  { %345 = vmatmul.bf16.gmra.mxu0 %v2676_v53 }
  0x92   :  { %394 = vmatmul.bf16.gmra.mxu1 %v2676_v53 }
  0xa1   :  { %350 = vmatmul.bf16.gmra.mxu0 %v2677_v60 }
  0xa2   :  { %399 = vmatmul.bf16.gmra.mxu1 %v2677_v60 }
  0xb1   :  { %355 = vmatmul.bf16.gmra.mxu0 %v2678_v5 }
  0xb2   :  { %404 = vmatmul.bf16.gmra.mxu1 %v2678_v5 }
  0xbe   :  { %v321_v11 = vpop.f32.mrf.mxu0 }
  0xbf   :  { %v370_v12 = vpop.f32.mrf.mxu1  ;;  %v322_v13 = vadd.f32 %v321_v11, %v3095_v9 }
  0xc0   :  { %v371_v14 = vadd.f32 %v370_v12, %v3097_v10 }
  0xc1   :  { %v3101_v16 = vmax.f32 %v322_v13, 0.0 }
  0xc2   :  { %v3103_v17 = vmax.f32 %v371_v14, 0.0 }
  0xc3   :  { %v667_v25 = vrot.slane %v3101_v16, 7  ;;  %v812_v29 = vrot.slane %v3101_v16, 1 }
  0xc4   :  { %v957_v23 = vpack.c.bf16 %v3103_v17, %v3101_v16  ;;  %v668_v30 = vrot.slane %v3103_v17, 7  ;;  %v813_v33 = vrot.slane %v3103_v17, 1 }
  0xc6   :  { %v323_v19 = vpop.f32.mrf.mxu0  ;;  %v1085_v37 = vunpack.c.l.b16 %v957_v23  ;;  %v1086_v38 = vunpack.c.h.b16 %v957_v23 }
  0xc7   :  { %v324_v20 = vadd.f32 %v323_v19, %v3095_v9  ;;  %v372_v21 = vpop.f32.mrf.mxu1 }
  0xc8   :  { %v373_v22 = vadd.f32 %v372_v21, %v3097_v10 }
  0xc9   :  { %v412_v24 = vmax.f32 %v324_v20, 0.0  ;;  %v491_v20 = vand.u32 15, %v447_v63 }
  0xca   :  { %v413_v26 = vmax.f32 %v373_v22, 0.0  ;;  %v446_v22 = vadd.s32 24, %v3105_v18 }
  0xcb   :  { %v669_v31 = vrot.slane %v412_v24, 7  ;;  %v814_v32 = vrot.slane %v412_v24, 1  ;;  %vm3181_vm4 = vcmp.eq.s32.totalorder %v491_v20, 0 }
  0xcc   :  { %v670_v34 = vrot.slane %v413_v26, 7  ;;  %v815_v35 = vrot.slane %v413_v26, 1  ;;  %v958_v36 = vpack.c.bf16 %v413_v26, %v412_v24 }
  0xcd   :  { %v728_v39 = vsel %vm699_vm0, %v667_v25, %v669_v31  ;;  %v873_v40 = vsel %vm844_vm1, %v812_v29, %v814_v32 }
  0xce   :  { %v326_v41 = vpop.f32.mrf.mxu0  ;;  %v1087_v42 = vunpack.c.l.b16 %v958_v36  ;;  %v1088_v43 = vunpack.c.h.b16 %v958_v36  ;;  %v729_v44 = vsel %vm699_vm0, %v668_v30, %v670_v34  ;;  %v874_v45 = vsel %vm844_vm1, %v813_v33, %v815_v35 }
  0xcf   :  { %v327_v46 = vadd.f32 %v326_v41, %v3095_v9  ;;  %v375_v47 = vpop.f32.mrf.mxu1  ;;  %v3136_v48 = vpack.c.bf16 %v729_v44, %v728_v39  ;;  %v973_v50 = vpack.c.bf16 %v874_v45, %v873_v40 }
  0xd0   :  { %v376_v51 = vadd.f32 %v375_v47, %v3097_v10  ;;  %v1117_v52 = vpack.c.b16 %v1087_v42, %v1085_v37  ;;  %v1118_v53 = vpack.c.b16 %v1088_v43, %v1086_v38 }
  0xd1   :  { %v414_v54 = vmax.f32 %v327_v46, 0.0  ;;  %v1165_v26 = vunpack.c.l.b16 %v973_v50  ;;  %v1166_v27 = vunpack.c.h.b16 %v973_v50 }
  0xd2   :  { %v415_v56 = vmax.f32 %v376_v51, 0.0  ;;  %1723 = vmatmul.bf16.vlgmr.msrb.gmra.mxu0 %v1117_v52  ;;  %1772 = vmatmul.bf16.vlgmr.msrb.gmra.mxu1 %v1118_v53  ;;  %v484_v52 = vand.u32 15, %v446_v22 }
  0xd3   :  { %v671_v57 = vrot.slane %v414_v54, 7  ;;  %v816_v58 = vrot.slane %v414_v54, 1 }
  0xd4   :  { %v672_v60 = vrot.slane %v415_v56, 7  ;;  %v817_v61 = vrot.slane %v415_v56, 1  ;;  %v959_v3 = vpack.c.bf16 %v415_v56, %v414_v54  ;;  %vm3192_vm5 = vcmp.eq.s32.totalorder %v484_v52, 15 }
  0xd5   :  { %v726_v62 = vsel %vm699_vm0, %v669_v31, %v671_v57  ;;  %v871_v1 = vsel %vm844_vm1, %v814_v32, %v816_v58 }
  0xd6   :  { %v328_v2 = vpop.f32.mrf.mxu0  ;;  %v727_v4 = vsel %vm699_vm0, %v670_v34, %v672_v60  ;;  %v768_v5 = vsel %vm3139_vm2, 0.0, %v726_v62  ;;  %v872_v11 = vsel %vm844_vm1, %v815_v35, %v817_v61  ;;  %v911_v14 = vsel %vm3146_vm3, 0.0, %v871_v1 }
  0xd7   :  { %v329_v6 = vadd.f32 %v328_v2, %v3095_v9  ;;  %v377_v7 = vpop.f32.mrf.mxu1  ;;  %v769_v8 = vsel %vm3139_vm2, 0.0, %v727_v4  ;;  %v912_v15 = vsel %vm3146_vm3, 0.0, %v872_v11  ;;  %v1089_v24 = vunpack.c.l.b16 %v959_v3 }
  0xd8   :  { %v378_v12 = vadd.f32 %v377_v7, %v3097_v10  ;;  %v943_v13 = vpack.c.bf16 %v769_v8, %v768_v5  ;;  %v974_v21 = vpack.c.bf16 %v912_v15, %v911_v14  ;;  %v1090_v38 = vunpack.c.h.b16 %v959_v3 }
  0xd9   :  { %v416_v19 = vmax.f32 %v329_v6, 0.0  ;;  %v449_v7 = vadd.s32 48, %v3105_v18 }
  0xda   :  { %v417_v23 = vmax.f32 %v378_v12, 0.0  ;;  %v1167_v32 = vunpack.c.l.b16 %v974_v21  ;;  %v1168_v34 = vunpack.c.h.b16 %v974_v21  ;;  %v1010_v62 = vunpack.c.h.b16 %v943_v13 }
  0xdb   :  { %v673_v28 = vrot.slane %v416_v19, 7  ;;  %v818_v31 = vrot.slane %v416_v19, 1 }
  0xdc   :  { %v674_v35 = vrot.slane %v417_v23, 7  ;;  %v819_v36 = vrot.slane %v417_v23, 1  ;;  %v960_v37 = vpack.c.bf16 %v417_v23, %v416_v19  ;;  %v3169_v40 = vpack.c.b16 %v1167_v32, %v1165_v26 }
  0xdd   :  { %v724_v39 = vsel %vm699_vm0, %v671_v57, %v673_v28  ;;  %v3171_v41 = vpack.c.b16 %v1168_v34, %v1166_v27  ;;  %v869_v42 = vsel %vm844_vm1, %v816_v58, %v818_v31  ;;  %v1009_v57 = vunpack.c.l.b16 %v943_v13 }
  0xde   :  { %v331_v43 = vpop.f32.mrf.mxu0  ;;  %v1091_v44 = vunpack.c.l.b16 %v960_v37  ;;  %v1092_v45 = vunpack.c.h.b16 %v960_v37  ;;  %v725_v46 = vsel %vm699_vm0, %v672_v60, %v674_v35  ;;  %v870_v47 = vsel %vm844_vm1, %v817_v61, %v819_v36 }
  0xdf   :  { %v332_v49 = vadd.f32 %v331_v43, %v3095_v9  ;;  %v380_v50 = vpop.f32.mrf.mxu1  ;;  %v944_v51 = vpack.c.bf16 %v725_v46, %v724_v39  ;;  %v975_v53 = vpack.c.bf16 %v870_v47, %v869_v42  ;;  %v448_v34 = vadd.s32 40, %v3105_v18 }
  0xe0   :  { %v381_v54 = vadd.f32 %v380_v50, %v3097_v10  ;;  %v1119_v55 = vpack.c.b16 %v1091_v44, %v1089_v24  ;;  %v1120_v56 = vpack.c.b16 %v1092_v45, %v1090_v38 }
  0xe1   :  { %v418_v58 = vmax.f32 %v332_v49, 0.0  ;;  %v1011_v59 = vunpack.c.l.b16 %v944_v51  ;;  %v1012_v63 = vunpack.c.h.b16 %v944_v51  ;;  %v1169_v38 = vunpack.c.l.b16 %v975_v53 }
  0xe2   :  { %v419_v0 = vmax.f32 %v381_v54, 0.0  ;;  %1728 = vmatmul.bf16.gmra.mxu0 %v1119_v55  ;;  %1777 = vmatmul.bf16.gmra.mxu1 %v1120_v56  ;;  %v1170_v39 = vunpack.c.h.b16 %v975_v53 }
  0xe3   :  { %v675_v61 = vrot.slane %v418_v58, 7  ;;  %v820_v1 = vrot.slane %v418_v58, 1  ;;  %v3185_v2 = vpack.c.b16 %v1011_v59, %v1009_v57  ;;  %v3187_v3 = vpack.c.b16 %v1012_v63, %v1010_v62 }
  0xe4   :  { %v676_v4 = vrot.slane %v419_v0, 7  ;;  %v821_v5 = vrot.slane %v419_v0, 1  ;;  %v961_v13 = vpack.c.bf16 %v419_v0, %v418_v58  ;;  %v498_v0 = vand.u32 15, %v448_v34 }
  0xe5   :  { %v722_v6 = vsel %vm699_vm0, %v673_v28, %v675_v61  ;;  %v867_v11 = vsel %vm844_vm1, %v818_v31, %v820_v1  ;;  %v505_v31 = vand.u32 15, %v449_v7 }
  0xe6   :  { %v333_v12 = vpop.f32.mrf.mxu0  ;;  %v723_v14 = vsel %vm699_vm0, %v674_v35, %v676_v4  ;;  %v772_v15 = vsel %vm3181_vm4, 0.0, %v722_v6  ;;  %v868_v22 = vsel %vm844_vm1, %v819_v36, %v821_v5  ;;  %v915_v26 = vsel %vm3192_vm5, 0.0, %v867_v11 }
  0xe7   :  { %v334_v19 = vadd.f32 %v333_v12, %v3095_v9  ;;  %v382_v20 = vpop.f32.mrf.mxu1  ;;  %v773_v21 = vsel %vm3181_vm4, 0.0, %v723_v14  ;;  %v916_v27 = vsel %vm3192_vm5, 0.0, %v868_v22  ;;  %v1093_v37 = vunpack.c.l.b16 %v961_v13 }
  0xe8   :  { %v383_v23 = vadd.f32 %v382_v20, %v3097_v10  ;;  %v945_v24 = vpack.c.bf16 %v773_v21, %v772_v15  ;;  %v976_v32 = vpack.c.bf16 %v916_v27, %v915_v26  ;;  %v1094_v49 = vunpack.c.h.b16 %v961_v13 }
  0xe9   :  { %v420_v28 = vmax.f32 %v334_v19, 0.0  ;;  %vm3227_vm6 = vcmp.eq.s32.totalorder %v505_v31, 0  ;;  %vm3238_vm7 = vcmp.eq.s32.totalorder %v498_v0, 15  ;;  %vm2105_vm4 = vcmask 1043459  }
  0xea   :  { %v421_v35 = vmax.f32 %v383_v23, 0.0  ;;  %v1171_v43 = vunpack.c.l.b16 %v976_v32  ;;  %v1172_v44 = vunpack.c.h.b16 %v976_v32  ;;  %v1014_v12 = vunpack.c.h.b16 %v945_v24 }
  0xeb   :  { %v677_v42 = vrot.slane %v420_v28, 7  ;;  %v822_v36 = vrot.slane %v420_v28, 1  ;;  %vm2107_vm5 = vcmask 1044484  }
  0xec   :  { %v678_v45 = vrot.slane %v421_v35, 7  ;;  %v823_v46 = vrot.slane %v421_v35, 1  ;;  %v962_v47 = vpack.c.bf16 %v421_v35, %v420_v28  ;;  %v3215_v51 = vpack.c.b16 %v1171_v43, %v1169_v38 }
  0xed   :  { %v720_v50 = vsel %vm699_vm0, %v675_v61, %v677_v42  ;;  %v3217_v52 = vpack.c.b16 %v1172_v44, %v1170_v39  ;;  %v865_v54 = vsel %vm844_vm1, %v820_v1, %v822_v36  ;;  %v1013_v1 = vunpack.c.l.b16 %v945_v24 }
  0xee   :  { %v336_v55 = vpop.f32.mrf.mxu0  ;;  %v1095_v53 = vunpack.c.l.b16 %v962_v47  ;;  %v1096_v56 = vunpack.c.h.b16 %v962_v47  ;;  %v721_v57 = vsel %vm699_vm0, %v676_v4, %v678_v45  ;;  %v866_v58 = vsel %vm844_vm1, %v821_v5, %v823_v46 }
  0xef   :  { %v337_v59 = vadd.f32 %v336_v55, %v3095_v9  ;;  %v385_v62 = vpop.f32.mrf.mxu1  ;;  %v946_v63 = vpack.c.bf16 %v721_v57, %v720_v50  ;;  %v977_v60 = vpack.c.bf16 %v866_v58, %v865_v54  ;;  %v451_v24 = vadd.s32 64, %v3105_v18 }
  0xf0   :  { %v386_v61 = vadd.f32 %v385_v62, %v3097_v10  ;;  %v1121_v6 = vpack.c.b16 %v1095_v53, %v1093_v37  ;;  %v1122_v7 = vpack.c.b16 %v1096_v56, %v1094_v49  ;;  %v450_v50 = vadd.s32 56, %v3105_v18 }
  0xf1   :  { %v422_v8 = vmax.f32 %v337_v59, 0.0  ;;  %v1015_v11 = vunpack.c.l.b16 %v946_v63  ;;  %v1016_v13 = vunpack.c.h.b16 %v946_v63  ;;  %v519_v47 = vand.u32 15, %v451_v24 }
  0xf2   :  { %v423_v14 = vmax.f32 %v386_v61, 0.0  ;;  %1733 = vmatmul.bf16.gmra.mxu0 %v1121_v6  ;;  %1782 = vmatmul.bf16.gmra.mxu1 %v1122_v7  ;;  %v1173_v53 = vunpack.c.l.b16 %v977_v60  ;;  %v1174_v56 = vunpack.c.h.b16 %v977_v60  ;;  %v512_v24 = vand.u32 15, %v450_v50  ;;  %v2710_v50 = vld [vmem:[#allocation8 + $0x78] sm:$0xff] }
  0xf3   :  { %v679_v5 = vrot.slane %v422_v8, 7  ;;  %v824_v15 = vrot.slane %v422_v8, 1  ;;  %v3231_v19 = vpack.c.b16 %v1015_v11, %v1013_v1  ;;  %v3233_v20 = vpack.c.b16 %v1016_v13, %v1014_v12  ;;  %1666 = vmatpush.bf16.msra.mxu3 %v2710_v50 }
  0xf4   :  { %v680_v21 = vrot.slane %v423_v14, 7  ;;  %v825_v22 = vrot.slane %v423_v14, 1  ;;  %v963_v31 = vpack.c.bf16 %v423_v14, %v422_v8  ;;  %vm3275_vm8 = vcmp.eq.s32.totalorder %v519_v47, 0 }
  0xf5   :  { %v718_v23 = vsel %vm699_vm0, %v677_v42, %v679_v5  ;;  %v863_v27 = vsel %vm844_vm1, %v822_v36, %v824_v15  ;;  %vm3288_vm9 = vcmp.eq.s32.totalorder %v512_v24, 15 }
  0xf6   :  { %v338_v28 = vpop.f32.mrf.mxu0  ;;  %v719_v32 = vsel %vm699_vm0, %v678_v45, %v680_v21  ;;  %v776_v34 = vsel %vm3227_vm6, 0.0, %v718_v23  ;;  %v864_v39 = vsel %vm844_vm1, %v823_v46, %v825_v22  ;;  %v919_v43 = vsel %vm3238_vm7, 0.0, %v863_v27 }
  0xf7   :  { %v339_v35 = vadd.f32 %v338_v28, %v3095_v9  ;;  %v387_v37 = vpop.f32.mrf.mxu1  ;;  %v777_v38 = vsel %vm3227_vm6, 0.0, %v719_v32  ;;  %v920_v44 = vsel %vm3238_vm7, 0.0, %v864_v39  ;;  %v1097_v55 = vunpack.c.l.b16 %v963_v31 }
  0xf8   :  { %v388_v42 = vadd.f32 %v387_v37, %v3097_v10  ;;  %v947_v36 = vpack.c.bf16 %v777_v38, %v776_v34  ;;  %v978_v49 = vpack.c.bf16 %v920_v44, %v919_v43  ;;  %v1098_v61 = vunpack.c.h.b16 %v963_v31 }
  0xf9   :  { %v424_v45 = vmax.f32 %v339_v35, 0.0  ;;  %vm2109_vm6 = vcmask 1045509   ;;  %vm2111_vm7 = vcmask 1046534  }
  0xfa   :  { %v425_v54 = vmax.f32 %v388_v42, 0.0  ;;  %v1175_v58 = vunpack.c.l.b16 %v978_v49  ;;  %v1176_v59 = vunpack.c.h.b16 %v978_v49  ;;  %v1017_v31 = vunpack.c.l.b16 %v947_v36  ;;  %v2702_v49 = vld [vmem:[#allocation8 + $0x38] sm:$0xff] }
  0xfb   :  { %v681_v57 = vrot.slane %v424_v45, 7  ;;  %v826_v46 = vrot.slane %v424_v45, 1  ;;  %v1018_v35 = vunpack.c.h.b16 %v947_v36  ;;  %1617 = vmatpush.bf16.msra.mxu2 %v2702_v49  ;;  %v2708_v49 = vld [vmem:[#allocation8 + $0x68] sm:$0xff] }
  0xfc   :  { %v682_v62 = vrot.slane %v425_v54, 7  ;;  %v827_v63 = vrot.slane %v425_v54, 1  ;;  %v964_v0 = vpack.c.bf16 %v425_v54, %v424_v45  ;;  %v3261_v7 = vpack.c.b16 %v1175_v58, %v1173_v53 }
  0xfd   :  { %v716_v6 = vsel %vm699_vm0, %v679_v5, %v681_v57  ;;  %v3263_v1 = vpack.c.b16 %v1176_v59, %v1174_v56  ;;  %v861_v8 = vsel %vm844_vm1, %v824_v15, %v826_v46  ;;  %v3286_v54 = vadd.s32 80, %v3105_v18 }
  0xfe   :  { %v341_v11 = vpop.f32.mrf.mxu0  ;;  %v1099_v60 = vunpack.c.l.b16 %v964_v0  ;;  %v1100_v12 = vunpack.c.h.b16 %v964_v0  ;;  %v717_v13 = vsel %vm699_vm0, %v680_v21, %v682_v62  ;;  %v862_v14 = vsel %vm844_vm1, %v825_v22, %v827_v63  ;;  %v2700_v22 = vld [vmem:[#allocation8 + $0x28] sm:$0xff] }
  0xff   :  { %v342_v4 = vadd.f32 %v341_v11, %v3095_v9  ;;  %v390_v23 = vpop.f32.mrf.mxu1  ;;  %v948_v5 = vpack.c.bf16 %v717_v13, %v716_v6  ;;  %v3272_v26 = vpack.c.bf16 %v862_v14, %v861_v8  ;;  %v2709_v13 = vld [vmem:[#allocation8 + $0x70] sm:$0xff]  ;;  %v533_v14 = vand.u32 15, %v3286_v54 }
 0x100   :  { %v391_v27 = vadd.f32 %v390_v23, %v3097_v10  ;;  %v1123_v28 = vpack.c.b16 %v1099_v60, %v1097_v55  ;;  %v1124_v15 = vpack.c.b16 %v1100_v12, %v1098_v61  ;;  %v2701_v12 = vld [vmem:[#allocation8 + $0x30] sm:$0xff]  ;;  %v452_v23 = vadd.s32 72, %v3105_v18  ;;  %1667 = vmatpush.bf16.msra.mxu3 %v2709_v13 }
 0x101   :  { %v426_v32 = vmax.f32 %v342_v4, 0.0  ;;  %v1019_v34 = vunpack.c.l.b16 %v948_v5  ;;  %v1020_v37 = vunpack.c.h.b16 %v948_v5  ;;  %v1177_v24 = vunpack.c.l.b16 %v3272_v26  ;;  %1618 = vmatpush.bf16.msra.mxu2 %v2701_v12 }
 0x102   :  { %v427_v21 = vmax.f32 %v391_v27, 0.0  ;;  %1738 = vmatmul.bf16.gmra.mxu0 %v1123_v28  ;;  %1787 = vmatmul.bf16.gmra.mxu1 %v1124_v15  ;;  %v1178_v27 = vunpack.c.h.b16 %v3272_v26  ;;  %vm3342_vm10 = vcmp.eq.s32.totalorder %v533_v14, 0 }
 0x103   :  { %v683_v38 = vrot.slane %v426_v32, 7  ;;  %v828_v39 = vrot.slane %v426_v32, 1  ;;  %v3279_v42 = vpack.c.b16 %v1019_v34, %v1017_v31  ;;  %v3281_v43 = vpack.c.b16 %v1020_v37, %v1018_v35 }
 0x104   :  { %v684_v44 = vrot.slane %v427_v21, 7  ;;  %v829_v45 = vrot.slane %v427_v21, 1  ;;  %v965_v53 = vpack.c.bf16 %v427_v21, %v426_v32  ;;  %1668 = vmatpush.bf16.msra.mxu3 %v2708_v49 }
 0x105   :  { %v714_v36 = vsel %vm699_vm0, %v681_v57, %v683_v38  ;;  %v859_v55 = vsel %vm844_vm1, %v826_v46, %v828_v39  ;;  %1619 = vmatpush.bf16.msra.mxu2 %v2700_v22 }
 0x106   :  { %v343_v56 = vpop.f32.mrf.mxu0  ;;  %v715_v58 = vsel %vm699_vm0, %v682_v62, %v684_v44  ;;  %v780_v59 = vsel %vm3275_vm8, 0.0, %v714_v36  ;;  %v860_v6 = vsel %vm844_vm1, %v827_v63, %v829_v45  ;;  %v923_v62 = vsel %vm3288_vm9, 0.0, %v859_v55 }
 0x107   :  { %v344_v57 = vadd.f32 %v343_v56, %v3095_v9  ;;  %v392_v0 = vpop.f32.mrf.mxu1  ;;  %v781_v61 = vsel %vm3275_vm8, 0.0, %v715_v58  ;;  %v924_v11 = vsel %vm3288_vm9, 0.0, %v860_v6  ;;  %v1101_v63 = vunpack.c.l.b16 %v965_v53 }
 0x108   :  { %v393_v46 = vadd.f32 %v392_v0, %v3097_v10  ;;  %v949_v8 = vpack.c.bf16 %v781_v61, %v780_v59  ;;  %v980_v4 = vpack.c.bf16 %v924_v11, %v923_v62  ;;  %v1102_v21 = vunpack.c.h.b16 %v965_v53 }
 0x109   :  { %v3308_v60 = vmax.f32 %v344_v57, 0.0  ;;  %v526_v0 = vand.u32 15, %v452_v23  ;;  %vm2113_vm8 = vcmask 1047559  }
 0x10a   :  { %v3312_v5 = vmax.f32 %v393_v46, 0.0  ;;  %v1179_v31 = vunpack.c.l.b16 %v980_v4  ;;  %v1180_v32 = vunpack.c.h.b16 %v980_v4  ;;  %v1021_v62 = vunpack.c.l.b16 %v949_v8 }
 0x10b   :  { %v685_v28 = vrot.slane %v3308_v60, 7  ;;  %v830_v15 = vrot.slane %v3308_v60, 1  ;;  %vm3359_vm11 = vcmp.eq.s32.totalorder %v526_v0, 15 }
 0x10c   :  { %v686_v34 = vrot.slane %v3312_v5, 7  ;;  %v831_v35 = vrot.slane %v3312_v5, 1  ;;  %v966_v37 = vpack.c.bf16 %v3312_v5, %v3308_v60  ;;  %v3324_v50 = vpack.c.b16 %v1179_v31, %v1177_v24  ;;  %v2707_v60 = vld [vmem:[#allocation8 + $0x60] sm:$0xff] }
 0x10d   :  { %v712_v26 = vsel %vm699_vm0, %v683_v38, %v685_v28  ;;  %v3326_v36 = vpack.c.b16 %v1180_v32, %v1178_v27  ;;  %v857_v54 = vsel %vm844_vm1, %v828_v39, %v830_v15  ;;  %1669 = vmatpush.bf16.msra.mxu3 %v2707_v60  ;;  %v2698_v32 = vld [vmem:[#allocation8 + $0x18] sm:$0xff] }
 0x10e   :  { %v346_v47 = vpop.f32.mrf.mxu0  ;;  %v1103_v55 = vunpack.c.l.b16 %v966_v37  ;;  %v1104_v56 = vunpack.c.h.b16 %v966_v37  ;;  %v713_v58 = vsel %vm699_vm0, %v684_v44, %v686_v34  ;;  %v858_v53 = vsel %vm844_vm1, %v829_v45, %v831_v35  ;;  %v2699_v44 = vld [vmem:[#allocation8 + $0x20] sm:$0xff]  ;;  %v2706_v37 = vld [vmem:[#allocation8 + $0x58] sm:$0xff] }
 0x10f   :  { %v347_v59 = vadd.f32 %v346_v47, %v3095_v9  ;;  %v395_v57 = vpop.f32.mrf.mxu1  ;;  %v950_v38 = vpack.c.bf16 %v713_v58, %v712_v26  ;;  %v3335_v61 = vpack.c.bf16 %v858_v53, %v857_v54  ;;  %v1022_v45 = vunpack.c.h.b16 %v949_v8  ;;  %1620 = vmatpush.bf16.msra.mxu2 %v2699_v44 }
 0x110   :  { %v396_v39 = vadd.f32 %v395_v57, %v3097_v10  ;;  %v1125_v6 = vpack.c.b16 %v1103_v55, %v1101_v63  ;;  %v1126_v46 = vpack.c.b16 %v1104_v56, %v1102_v21  ;;  %v3357_v21 = vadd.s32 96, %v3105_v18 }
 0x111   :  { %v3338_v11 = vmax.f32 %v347_v59, 0.0  ;;  %v1023_v12 = vunpack.c.l.b16 %v950_v38  ;;  %v1024_v13 = vunpack.c.h.b16 %v950_v38  ;;  %v3370_v55 = vadd.s32 88, %v3105_v18  ;;  %1670 = vmatpush.bf16.msra.mxu3 %v2706_v37 }
 0x112   :  { %v3340_v4 = vmax.f32 %v396_v39, 0.0  ;;  %1743 = vmatmul.bf16.gmra.mxu0 %v1125_v6  ;;  %1792 = vmatmul.bf16.gmra.mxu1 %v1126_v46  ;;  %v2697_v39 = vld [vmem:[#allocation8 + $0x10] sm:$0xff]  ;;  %v547_v46 = vand.u32 15, %v3357_v21  ;;  %v1182_v44 = vunpack.c.h.b16 %v3335_v61  ;;  %v2696_v21 = vld [vmem:[#allocation8 + $0x8] sm:$0xff] }
 0x113   :  { %v687_v5 = vrot.slane %v3338_v11, 7  ;;  %v832_v63 = vrot.slane %v3338_v11, 1  ;;  %v3348_v24 = vpack.c.b16 %v1023_v12, %v1021_v62  ;;  %v3350_v27 = vpack.c.b16 %v1024_v13, %v1022_v45  ;;  %1621 = vmatpush.bf16.msra.mxu2 %v2698_v32  ;;  %v2705_v6 = vld [vmem:[#allocation8 + $0x50] sm:$0xff] }
 0x114   :  { %v688_v8 = vrot.slane %v3340_v4, 7  ;;  %v833_v31 = vrot.slane %v3340_v4, 1  ;;  %v540_v60 = vand.u32 15, %v3370_v55  ;;  %vm3412_vm12 = vcmp.eq.s32.totalorder %v547_v46, 0 }
 0x115   :  { %v710_v14 = vsel %vm699_vm0, %v685_v28, %v687_v5  ;;  %v855_v49 = vsel %vm844_vm1, %v830_v15, %v832_v63  ;;  %v967_v28 = vpack.c.bf16 %v3340_v4, %v3338_v11  ;;  %1671 = vmatpush.bf16.msra.mxu3 %v2705_v6 }
 0x116   :  { %v348_v26 = vpop.f32.mrf.mxu0  ;;  %v711_v54 = vsel %vm699_vm0, %v686_v34, %v688_v8  ;;  %v784_v47 = vsel %vm3342_vm10, 0.0, %v710_v14  ;;  %v856_v34 = vsel %vm844_vm1, %v831_v35, %v833_v31  ;;  %v927_v57 = vsel %vm3359_vm11, 0.0, %v855_v49 }
 0x117   :  { %v349_v56 = vadd.f32 %v348_v26, %v3095_v9  ;;  %v397_v58 = vpop.f32.mrf.mxu1  ;;  %v785_v15 = vsel %vm3342_vm10, 0.0, %v711_v54  ;;  %v928_v38 = vsel %vm3359_vm11, 0.0, %v856_v34  ;;  %v1181_v35 = vunpack.c.l.b16 %v3335_v61  ;;  %1622 = vmatpush.bf16.msra.mxu2 %v2697_v39  ;;  %v2704_v61 = vld [vmem:[#allocation8 + $0x48] sm:$0xff] }
 0x118   :  { %v398_v53 = vadd.f32 %v397_v58, %v3097_v10  ;;  %v951_v59 = vpack.c.bf16 %v785_v15, %v784_v47  ;;  %v982_v62 = vpack.c.bf16 %v928_v38, %v927_v57  ;;  %v1105_v14 = vunpack.c.l.b16 %v967_v28 }
 0x119   :  { %v3384_v0 = vmax.f32 %v349_v56, 0.0  ;;  %v1106_v56 = vunpack.c.h.b16 %v967_v28  ;;  %1672 = vmatpush.bf16.msra.mxu3 %v2704_v61  ;;  %vm3420_vm13 = vcmp.eq.s32.totalorder %v540_v60, 15 }
 0x11a   :  { %v3387_v11 = vmax.f32 %v398_v53, 0.0  ;;  %v1183_v13 = vunpack.c.l.b16 %v982_v62  ;;  %v1184_v4 = vunpack.c.h.b16 %v982_v62  ;;  %v1025_v57 = vunpack.c.l.b16 %v951_v59  ;;  %v2695_v62 = vld [vmem:[#allocation8] sm:$0xff] }
 0x11b   :  { %v689_v12 = vrot.slane %v3384_v0, 7  ;;  %v834_v45 = vrot.slane %v3384_v0, 1  ;;  %1623 = vmatpush.bf16.msra.mxu2 %v2696_v21 }
 0x11c   :  { %v690_v23 = vrot.slane %v3387_v11, 7  ;;  %v835_v32 = vrot.slane %v3387_v11, 1  ;;  %v968_v37 = vpack.c.bf16 %v3387_v11, %v3384_v0  ;;  %v3400_v49 = vpack.c.b16 %v1183_v13, %v1181_v35  ;;  %v2703_v11 = vld [vmem:[#allocation8 + $0x40] sm:$0xff] }
 0x11d   :  { %v708_v22 = vsel %vm699_vm0, %v687_v5, %v689_v12  ;;  %v3402_v26 = vpack.c.b16 %v1184_v4, %v1182_v44  ;;  %v853_v54 = vsel %vm844_vm1, %v832_v63, %v834_v45  ;;  %1673 = vmatpush.bf16.msra.mxu3 %v2703_v11 }
 0x11e   :  { %v351_v47 = vpop.f32.mrf.mxu0  ;;  %v1107_v55 = vunpack.c.l.b16 %v968_v37  ;;  %v1108_v58 = vunpack.c.h.b16 %v968_v37  ;;  %v709_v15 = vsel %vm699_vm0, %v688_v8, %v690_v23  ;;  %v854_v38 = vsel %vm844_vm1, %v833_v31, %v835_v32 }
 0x11f   :  { %v352_v34 = vadd.f32 %v351_v47, %v3095_v9  ;;  %v400_v53 = vpop.f32.mrf.mxu1  ;;  %v952_v5 = vpack.c.bf16 %v709_v15, %v708_v22  ;;  %v983_v6 = vpack.c.bf16 %v854_v38, %v853_v54  ;;  %v1026_v8 = vunpack.c.h.b16 %v951_v59  ;;  %1624 = vmatpush.bf16.msra.mxu2 %v2695_v62  ;;  %v2734_v15 = vld [vmem:[#allocation8 + $0x138] sm:$0xff] }
 0x120   :  { %v401_v0 = vadd.f32 %v400_v53, %v3097_v10  ;;  %v1127_v63 = vpack.c.b16 %v1107_v55, %v1105_v14  ;;  %v1128_v39 = vpack.c.b16 %v1108_v58, %v1106_v56  ;;  %v457_v54 = vadd.s32 112, %v3105_v18 }
 0x121   :  { %v434_v28 = vmax.f32 %v352_v34, 0.0  ;;  %v1027_v35 = vunpack.c.l.b16 %v952_v5  ;;  %v1028_v44 = vunpack.c.h.b16 %v952_v5  ;;  %v3430_v55 = vadd.s32 104, %v3105_v18  ;;  %v2742_v34 = vld [vmem:[#allocation8 + $0x178] sm:$0xff] }
 0x122   :  { %v435_v13 = vmax.f32 %v401_v0, 0.0  ;;  %1748 = vmatmul.bf16.gmra.mxu0 %v1127_v63  ;;  %1797 = vmatmul.bf16.gmra.mxu1 %v1128_v39 }
 0x123   :  { %v691_v37 = vrot.slane %v434_v28, 7  ;;  %v836_v31 = vrot.slane %v434_v28, 1  ;;  %v3416_v14 = vpack.c.b16 %v1027_v35, %v1025_v57  ;;  %v3418_v21 = vpack.c.b16 %v1028_v44, %v1026_v8  ;;  %1813 = vmatpush.bf16.msrb.mxu2 %v2734_v15  ;;  %1862 = vmatpush.bf16.msrb.mxu3 %v2742_v34 }
 0x124   :  { %v692_v61 = vrot.slane %v435_v13, 7  ;;  %v837_v22 = vrot.slane %v435_v13, 1  ;;  %v969_v56 = vpack.c.bf16 %v435_v13, %v434_v28  ;;  %v561_v28 = vand.u32 15, %v457_v54 }
 0x125   :  { %v706_v46 = vsel %vm699_vm0, %v689_v12, %v691_v37  ;;  %v851_v47 = vsel %vm844_vm1, %v834_v45, %v836_v31  ;;  %v554_v11 = vand.u32 15, %v3430_v55  ;;  %v1185_v44 = vunpack.c.l.b16 %v983_v6 }
 0x126   :  { %v353_v58 = vpop.f32.mrf.mxu0  ;;  %v707_v60 = vsel %vm699_vm0, %v690_v23, %v692_v61  ;;  %v788_v53 = vsel %vm3412_vm12, 0.0, %v706_v46  ;;  %v852_v45 = vsel %vm844_vm1, %v835_v32, %v837_v22  ;;  %v931_v38 = vsel %vm3420_vm13, 0.0, %v851_v47 }
 0x127   :  { %v354_v12 = vadd.f32 %v353_v58, %v3095_v9  ;;  %v402_v5 = vpop.f32.mrf.mxu1  ;;  %v789_v57 = vsel %vm3412_vm12, 0.0, %v707_v60  ;;  %v932_v63 = vsel %vm3420_vm13, 0.0, %v852_v45  ;;  %v1109_v8 = vunpack.c.l.b16 %v969_v56 }
 0x128   :  { %v403_v0 = vadd.f32 %v402_v5, %v3097_v10  ;;  %v953_v23 = vpack.c.bf16 %v789_v57, %v788_v53  ;;  %v984_v62 = vpack.c.bf16 %v932_v63, %v931_v38  ;;  %v1186_v32 = vunpack.c.h.b16 %v983_v6 }
 0x129   :  { %v436_v39 = vmax.f32 %v354_v12, 0.0  ;;  %v1110_v60 = vunpack.c.h.b16 %v969_v56  ;;  %v458_v63 = vadd.s32 120, %v3105_v18  ;;  %vm3468_vm14 = vcmp.eq.s32.totalorder %v561_v28, 0 }
 0x12a   :  { %v437_v35 = vmax.f32 %v403_v0, 0.0  ;;  %v1187_v46 = vunpack.c.l.b16 %v984_v62  ;;  %v1188_v47 = vunpack.c.h.b16 %v984_v62  ;;  %vm3481_vm15 = vcmp.eq.s32.totalorder %v554_v11, 15 }
 0x12b   :  { %v693_v13 = vrot.slane %v436_v39, 7  ;;  %v838_v4 = vrot.slane %v436_v39, 1  ;;  %v1007_v28 = vunpack.c.l.b16 %v3136_v48 }
 0x12c   :  { %v694_v58 = vrot.slane %v437_v35, 7  ;;  %v839_v15 = vrot.slane %v437_v35, 1  ;;  %v970_v34 = vpack.c.bf16 %v437_v35, %v436_v39  ;;  %v3449_v53 = vpack.c.b16 %v1187_v46, %v1185_v44 }
 0x12d   :  { %v704_v59 = vsel %vm699_vm0, %v691_v37, %v693_v13  ;;  %v3451_v54 = vpack.c.b16 %v1188_v47, %v1186_v32  ;;  %v849_v55 = vsel %vm844_vm1, %v836_v31, %v838_v4  ;;  %v1029_v35 = vunpack.c.l.b16 %v953_v23 }
 0x12e   :  { %v356_v12 = vpop.f32.mrf.mxu0  ;;  %v1111_v6 = vunpack.c.l.b16 %v970_v34  ;;  %v1112_v5 = vunpack.c.h.b16 %v970_v34  ;;  %v705_v57 = vsel %vm699_vm0, %v692_v61, %v694_v58  ;;  %v850_v45 = vsel %vm844_vm1, %v837_v22, %v839_v15 }
 0x12f   :  { %v357_v56 = vadd.f32 %v356_v12, %v3095_v9  ;;  %v405_v38 = vpop.f32.mrf.mxu1  ;;  %v954_v37 = vpack.c.bf16 %v705_v57, %v704_v59  ;;  %v3460_v0 = vpack.c.bf16 %v850_v45, %v849_v55  ;;  %v1030_v61 = vunpack.c.h.b16 %v953_v23 }
 0x130   :  { %v406_v39 = vadd.f32 %v405_v38, %v3097_v10  ;;  %v1129_v31 = vpack.c.b16 %v1111_v6, %v1109_v8  ;;  %v1130_v62 = vpack.c.b16 %v1112_v5, %v1110_v60  ;;  %v463_v12 = vand.u32 15, %v3105_v18 }
 0x131   :  { %v3464_v44 = vmax.f32 %v357_v56, 0.0  ;;  %v1031_v32 = vunpack.c.l.b16 %v954_v37  ;;  %v1032_v46 = vunpack.c.h.b16 %v954_v37  ;;  %v568_v45 = vand.u32 15, %v458_v63 }
 0x132   :  { %v3466_v47 = vmax.f32 %v406_v39, 0.0  ;;  %1753 = vmatmul.bf16.gmra.mxu0 %v1129_v31  ;;  %1802 = vmatmul.bf16.gmra.mxu1 %v1130_v62  ;;  %v1008_v37 = vunpack.c.h.b16 %v3136_v48  ;;  %v2733_v39 = vld [vmem:[#allocation8 + $0x130] sm:$0xff]  ;;  %vm3505_vm2 = vcmp.eq.s32.totalorder %v463_v12, 0  ;;  %v1189_v22 = vunpack.c.l.b16 %v3460_v0  ;;  %v2731_v48 = vld [vmem:[#allocation8 + $0x120] sm:$0xff] }
 0x133   :  { %v695_v34 = vrot.slane %v3464_v44, 7  ;;  %v840_v59 = vrot.slane %v3464_v44, 1  ;;  %v3474_v8 = vpack.c.b16 %v1031_v32, %v1029_v35  ;;  %v3476_v60 = vpack.c.b16 %v1032_v46, %v1030_v61  ;;  %v2741_v35 = vld [vmem:[#allocation8 + $0x170] sm:$0xff]  ;;  %1814 = vmatpush.bf16.msrb.mxu2 %v2733_v39 }
 0x134   :  { %v696_v55 = vrot.slane %v3466_v47, 7  ;;  %v841_v23 = vrot.slane %v3466_v47, 1  ;;  %v971_v56 = vpack.c.bf16 %v3466_v47, %v3464_v44  ;;  %1863 = vmatpush.bf16.msrb.mxu3 %v2741_v35  ;;  %vm3512_vm3 = vcmp.eq.s32.totalorder %v568_v45, 15 }
 0x135   :  { %v702_v5 = vsel %vm699_vm0, %v693_v13, %v695_v34  ;;  %v847_v57 = vsel %vm844_vm1, %v838_v4, %v840_v59 }
 0x136   :  { %v358_v38 = vpop.f32.mrf.mxu0  ;;  %v703_v11 = vsel %vm699_vm0, %v694_v58, %v696_v55  ;;  %v792_v31 = vsel %vm3468_vm14, 0.0, %v702_v5  ;;  %v848_v63 = vsel %vm844_vm1, %v839_v15, %v841_v23  ;;  %v935_v44 = vsel %vm3481_vm15, 0.0, %v847_v57 }
 0x137   :  { %v359_v62 = vadd.f32 %v358_v38, %v3095_v9  ;;  %v407_v13 = vpop.f32.mrf.mxu1  ;;  %v793_v4 = vsel %vm3468_vm14, 0.0, %v703_v11  ;;  %v936_v9 = vsel %vm3481_vm15, 0.0, %v848_v63  ;;  %v1114_v12 = vunpack.c.h.b16 %v971_v56 }
 0x138   :  { %v408_v32 = vadd.f32 %v407_v13, %v3097_v10  ;;  %v955_v61 = vpack.c.bf16 %v793_v4, %v792_v31  ;;  %v986_v47 = vpack.c.bf16 %v936_v9, %v935_v44  ;;  %v1113_v10 = vunpack.c.l.b16 %v971_v56 }
 0x139   :  { %v440_v46 = vmax.f32 %v359_v62, 0.0  ;;  %v1190_v57 = vunpack.c.h.b16 %v3460_v0 }
 0x13a   :  { %v441_v5 = vmax.f32 %v408_v32, 0.0  ;;  %v1191_v11 = vunpack.c.l.b16 %v986_v47  ;;  %v1192_v31 = vunpack.c.h.b16 %v986_v47  ;;  %v1033_v35 = vunpack.c.l.b16 %v955_v61 }
 0x13b   :  { %v697_v38 = vrot.slane %v440_v46, 7  ;;  %v842_v39 = vrot.slane %v440_v46, 1 }
 0x13c   :  { %v698_v6 = vrot.slane %v441_v5, 7  ;;  %v843_v13 = vrot.slane %v441_v5, 1  ;;  %v972_v62 = vpack.c.bf16 %v441_v5, %v440_v46  ;;  %v3523_v63 = vpack.c.b16 %v1191_v11, %v1189_v22 }
 0x13d   :  { %v730_v45 = vsel %vm699_vm0, %v697_v38, %v667_v25  ;;  %v700_v4 = vsel %vm699_vm0, %v695_v34, %v697_v38  ;;  %v3525_v56 = vpack.c.b16 %v1192_v31, %v1190_v57  ;;  %v845_v46 = vsel %vm844_vm1, %v840_v59, %v842_v39 }
 0x13e   :  { %v1115_v0 = vunpack.c.l.b16 %v972_v62  ;;  %v1116_v44 = vunpack.c.h.b16 %v972_v62  ;;  %v731_v32 = vsel %vm699_vm0, %v698_v6, %v668_v30  ;;  %v764_v9 = vsel %vm3505_vm2, 0.0, %v730_v45  ;;  %v2740_v62 = vld [vmem:[#allocation8 + $0x168] sm:$0xff] }
 0x13f   :  { %v765_v25 = vsel %vm3505_vm2, 0.0, %v731_v32  ;;  %v701_v34 = vsel %vm699_vm0, %v696_v55, %v698_v6  ;;  %v846_v47 = vsel %vm844_vm1, %v841_v23, %v843_v13  ;;  %v1034_v30 = vunpack.c.h.b16 %v955_v61  ;;  %1864 = vmatpush.bf16.msrb.mxu3 %v2740_v62 }
 0x140   :  { %v1131_v22 = vpack.c.b16 %v1115_v0, %v1113_v10  ;;  %v1132_v5 = vpack.c.b16 %v1116_v44, %v1114_v12  ;;  %v941_v57 = vpack.c.bf16 %v765_v25, %v764_v9  ;;  %v956_v38 = vpack.c.bf16 %v701_v34, %v700_v4  ;;  %v2729_v44 = vld [vmem:[#allocation8 + $0x110] sm:$0xff] }
 0x141   :  { %v875_v58 = vsel %vm844_vm1, %v842_v39, %v812_v29  ;;  %v876_v55 = vsel %vm844_vm1, %v843_v13, %v813_v33  ;;  %v987_v11 = vpack.c.bf16 %v846_v47, %v845_v46  ;;  %v2732_v13 = vld [vmem:[#allocation8 + $0x128] sm:$0xff]  ;;  %vm2101_vm0 = vcmask 1041409  }
 0x142   :  { %1758 = vmatmul.bf16.gmra.mxu0 %v1131_v22  ;;  %1807 = vmatmul.bf16.gmra.mxu1 %v1132_v5  ;;  %v1005_v59 = vunpack.c.l.b16 %v941_v57  ;;  %v1006_v23 = vunpack.c.h.b16 %v941_v57  ;;  %v1035_v10 = vunpack.c.l.b16 %v956_v38  ;;  %v1036_v12 = vunpack.c.h.b16 %v956_v38 }
 0x143   :  { %v939_v61 = vsel %vm3512_vm3, 0.0, %v875_v58  ;;  %v940_v16 = vsel %vm3512_vm3, 0.0, %v876_v55  ;;  %v1193_v31 = vunpack.c.l.b16 %v987_v11  ;;  %v1194_v6 = vunpack.c.h.b16 %v987_v11  ;;  %1815 = vmatpush.bf16.msrb.mxu2 %v2732_v13 }
 0x144   :  { %v1037_v29 = vpack.c.b16 %v1007_v28, %v1005_v59  ;;  %v1038_v17 = vpack.c.b16 %v1008_v37, %v1006_v23  ;;  %v1051_v39 = vpack.c.b16 %v1035_v10, %v1033_v35  ;;  %v1052_v18 = vpack.c.b16 %v1036_v12, %v1034_v30  ;;  %v2739_v28 = vld [vmem:[#allocation8 + $0x160] sm:$0xff]  ;;  %v2730_v37 = vld [vmem:[#allocation8 + $0x118] sm:$0xff] }
 0x145   :  { %v988_v33 = vpack.c.bf16 %v940_v16, %v939_v61  ;;  %1865 = vmatpush.bf16.msrb.mxu3 %v2739_v28  ;;  %v2738_v35 = vld [vmem:[#allocation8 + $0x158] sm:$0xff]  ;;  %vm2103_vm1 = vcmask 1042434  }
 0x146   :  { %1625 = vmatmul.bf16.vlgmr.msra.gmra.mxu2 %v1037_v29  ;;  %1674 = vmatmul.bf16.vlgmr.msra.gmra.mxu3 %v1038_v17 }
 0x147   :  { %v1195_v45 = vunpack.c.l.b16 %v988_v33  ;;  %v1196_v4 = vunpack.c.h.b16 %v988_v33  ;;  %1816 = vmatpush.bf16.msrb.mxu2 %v2731_v48 }
 0x149   :  { %v3555_v0 = vpack.c.b16 %v1195_v45, %v1193_v31  ;;  %v3557_v15 = vpack.c.b16 %v1196_v4, %v1194_v6  ;;  %1866 = vmatpush.bf16.msrb.mxu3 %v2738_v35 }
 0x14b   :  { %1817 = vmatpush.bf16.msrb.mxu2 %v2730_v37 }
 0x14f   :  { %1818 = vmatpush.bf16.msrb.mxu2 %v2729_v44 }
 0x156   :  { %1630 = vmatmul.bf16.gmra.mxu2 %v3185_v2  ;;  %1679 = vmatmul.bf16.gmra.mxu3 %v3187_v3  ;;  %v2737_v2 = vld [vmem:[#allocation8 + $0x150] sm:$0xff]  ;;  %v2728_v3 = vld [vmem:[#allocation8 + $0x108] sm:$0xff] }
 0x157   :  { %1867 = vmatpush.bf16.msrb.mxu3 %v2737_v2  ;;  %1819 = vmatpush.bf16.msrb.mxu2 %v2728_v3 }
 0x166   :  { %1635 = vmatmul.bf16.gmra.mxu2 %v3231_v19  ;;  %1684 = vmatmul.bf16.gmra.mxu3 %v3233_v20  ;;  %v2736_v19 = vld [vmem:[#allocation8 + $0x148] sm:$0xff]  ;;  %v2727_v20 = vld [vmem:[#allocation8 + $0x100] sm:$0xff] }
 0x167   :  { %1868 = vmatpush.bf16.msrb.mxu3 %v2736_v19  ;;  %1820 = vmatpush.bf16.msrb.mxu2 %v2727_v20 }
 0x176   :  { %1640 = vmatmul.bf16.gmra.mxu2 %v3279_v42  ;;  %1689 = vmatmul.bf16.gmra.mxu3 %v3281_v43  ;;  %v2735_v42 = vld [vmem:[#allocation8 + $0x140] sm:$0xff]  ;;  %v3571_v43 = vpop.f32.mrf.mxu0 }
 0x177   :  { %1869 = vmatpush.bf16.msrb.mxu3 %v2735_v42 }
 0x186   :  { %1645 = vmatmul.bf16.gmra.mxu2 %v3348_v24  ;;  %1694 = vmatmul.bf16.gmra.mxu3 %v3350_v27  ;;  %v3573_v24 = vpop.f32.mrf.mxu1  ;;  %v3580_v27 = vld [vmem:[%s3709_s5] ss:$0 sm:$0xff] }
 0x18e   :  { %v3585_v32 = vpop.f32.mrf.mxu1 }
 0x196   :  { %1650 = vmatmul.bf16.gmra.mxu2 %v3416_v14  ;;  %1699 = vmatmul.bf16.gmra.mxu3 %v3418_v21  ;;  %v3594_v47 = vpop.f32.mrf.mxu1 }
 0x19e   :  { %v3603_v58 = vpop.f32.mrf.mxu1 }
 0x1a6   :  { %1655 = vmatmul.bf16.gmra.mxu2 %v3474_v8  ;;  %1704 = vmatmul.bf16.gmra.mxu3 %v3476_v60  ;;  %v3582_v8 = vpop.f32.mrf.mxu0  ;;  %v3613_v61 = vpop.f32.mrf.mxu1 }
 0x1b6   :  { %1660 = vmatmul.bf16.gmra.mxu2 %v1051_v39  ;;  %1709 = vmatmul.bf16.gmra.mxu3 %v1052_v18 }
 0x1c6   :  { %1821 = vmatmul.bf16.vlgmr.msrb.gmra.mxu2 %v3169_v40  ;;  %1870 = vmatmul.bf16.vlgmr.msrb.gmra.mxu3 %v3171_v41  ;;  %v3590_v41 = vpop.f32.mrf.mxu0 }
 0x1c9   :  { %v1626_v14 = vpop.f32.mrf.mxu2  ;;  %v1675_v21 = vpop.f32.mrf.mxu3 }
 0x1ca   :  { %v1627_v60 = vadd.f32 %v3580_v27, %v1626_v14 }
 0x1cc   :  { %v3587_v9 = vadd.f32 %v1675_v21, %v1627_v60 }
 0x1ce   :  { %v3601_v30 = vpop.f32.mrf.mxu0 }
 0x1d1   :  { %v1628_v25 = vpop.f32.mrf.mxu2  ;;  %v1677_v34 = vpop.f32.mrf.mxu3 }
 0x1d2   :  { %v1629_v40 = vadd.f32 %v3580_v27, %v1628_v25 }
 0x1d4   :  { %v3592_v46 = vadd.f32 %v1677_v34, %v1629_v40 }
 0x1d6   :  { %1826 = vmatmul.bf16.gmra.mxu2 %v3215_v51  ;;  %1875 = vmatmul.bf16.gmra.mxu3 %v3217_v52  ;;  %v3610_v51 = vpop.f32.mrf.mxu0 }
 0x1d9   :  { %v1631_v22 = vpop.f32.mrf.mxu2  ;;  %v1680_v5 = vpop.f32.mrf.mxu3 }
 0x1da   :  { %v1632_v57 = vadd.f32 %v3580_v27, %v1631_v22 }
 0x1dc   :  { %v3599_v38 = vadd.f32 %v1680_v5, %v1632_v57 }
 0x1de   :  { %v3618_v18 = vpop.f32.mrf.mxu0 }
 0x1e1   :  { %v1633_v55 = vpop.f32.mrf.mxu2  ;;  %v1682_v11 = vpop.f32.mrf.mxu3 }
 0x1e2   :  { %v1634_v59 = vadd.f32 %v3580_v27, %v1633_v55 }
 0x1e4   :  { %v3606_v23 = vadd.f32 %v1682_v11, %v1634_v59 }
 0x1e6   :  { %1831 = vmatmul.bf16.gmra.mxu2 %v3261_v7  ;;  %1880 = vmatmul.bf16.gmra.mxu3 %v3263_v1  ;;  %v3622_v7 = vpop.f32.mrf.mxu1  ;;  %v1739_v62 = vpop.f32.mrf.mxu0 }
 0x1e9   :  { %v1636_v52 = vpop.f32.mrf.mxu2  ;;  %v1685_v10 = vpop.f32.mrf.mxu3 }
 0x1ea   :  { %v1637_v12 = vadd.f32 %v3580_v27, %v1636_v52 }
 0x1ec   :  { %v3615_v16 = vadd.f32 %v1685_v10, %v1637_v12 }
 0x1ee   :  { %v1788_v4 = vpop.f32.mrf.mxu1 }
 0x1f1   :  { %v1638_v29 = vpop.f32.mrf.mxu2  ;;  %v1687_v17 = vpop.f32.mrf.mxu3 }
 0x1f2   :  { %v1639_v39 = vadd.f32 %v3580_v27, %v1638_v29 }
 0x1f4   :  { %v3620_v33 = vadd.f32 %v1687_v17, %v1639_v39  ;;  %v1725_v17 = vadd.f32 %v3571_v43, %v3587_v9  ;;  %v1730_v9 = vadd.f32 %v3590_v41, %v3599_v38 }
 0x1f6   :  { %1836 = vmatmul.bf16.gmra.mxu2 %v3324_v50  ;;  %1885 = vmatmul.bf16.gmra.mxu3 %v3326_v36 }
 0x1f9   :  { %v1641_v1 = vpop.f32.mrf.mxu2  ;;  %v1690_v31 = vpop.f32.mrf.mxu3 }
 0x1fa   :  { %v1642_v6 = vadd.f32 %v3580_v27, %v1641_v1  ;;  %v1774_v1 = vadd.f32 %v3573_v24, %v1725_v17  ;;  %v2748_v17 = vld [vmem:[#allocation10 + $0x28] sm:$0xff] }
 0x1fc   :  { %v1691_v13 = vadd.f32 %v1690_v31, %v1642_v6  ;;  %v2750_v31 = vld [vmem:[#allocation10 + $0x38] sm:$0xff] }
 0x1fd   :  { %2165 = vmatpush.bf16.msra.mxu1 %v2750_v31  ;;  %v1790_v31 = vpop.f32.mrf.mxu1 }
 0x1fe   :  { %v1740_v45 = vadd.f32 %v1739_v62, %v1691_v13  ;;  %v1727_v62 = vadd.f32 %v3582_v8, %v3592_v46  ;;  %v2749_v8 = vld [vmem:[#allocation10 + $0x30] sm:$0xff] }
 0x200   :  { %v3627_v48 = vadd.f32 %v1788_v4, %v1740_v45  ;;  %v1776_v4 = vadd.f32 %v3585_v32, %v1727_v62  ;;  %v1732_v32 = vadd.f32 %v3601_v30, %v3606_v23 }
 0x201   :  { %v1643_v28 = vpop.f32.mrf.mxu2  ;;  %v1692_v37 = vpop.f32.mrf.mxu3  ;;  %2166 = vmatpush.bf16.msra.mxu1 %v2749_v8 }
 0x202   :  { %v1644_v35 = vadd.f32 %v3580_v27, %v1643_v28  ;;  %v1781_v41 = vadd.f32 %v3603_v58, %v1732_v32  ;;  %v2756_v58 = vld [vmem:[#allocation11 + $0x28] sm:$0xff]  ;;  %v2755_v32 = vld [vmem:[#allocation11 + $0x20] sm:$0xff] }
 0x204   :  { %v3630_v44 = vadd.f32 %v1692_v37, %v1644_v35 }
 0x205   :  { %2167 = vmatpush.bf16.msra.mxu1 %v2748_v17 }
 0x206   :  { %1841 = vmatmul.bf16.gmra.mxu2 %v3400_v49  ;;  %1890 = vmatmul.bf16.gmra.mxu3 %v3402_v26 }
 0x209   :  { %v1646_v50 = vpop.f32.mrf.mxu2  ;;  %v1695_v36 = vpop.f32.mrf.mxu3 }
 0x20a   :  { %v1647_v2 = vadd.f32 %v3580_v27, %v1646_v50 }
 0x20c   :  { %v3635_v3 = vadd.f32 %v1695_v36, %v1647_v2  ;;  %v1779_v2 = vadd.f32 %v3594_v47, %v1730_v9  ;;  %v1735_v47 = vadd.f32 %v3610_v51, %v3615_v16 }
 0x20e   :  { %v1784_v30 = vadd.f32 %v3613_v61, %v1735_v47 }
 0x211   :  { %v3637_v19 = vpop.f32.mrf.mxu2  ;;  %v3639_v20 = vpop.f32.mrf.mxu3 }
 0x216   :  { %1846 = vmatmul.bf16.gmra.mxu2 %v3449_v53  ;;  %1895 = vmatmul.bf16.gmra.mxu3 %v3451_v54 }
 0x219   :  { %v1651_v42 = vpop.f32.mrf.mxu2  ;;  %v1700_v14 = vpop.f32.mrf.mxu3 }
 0x21a   :  { %v1652_v49 = vadd.f32 %v3580_v27, %v1651_v42 }
 0x21c   :  { %v3644_v21 = vadd.f32 %v1700_v14, %v1652_v49 }
 0x221   :  { %v1653_v26 = vpop.f32.mrf.mxu2  ;;  %v1702_v60 = vpop.f32.mrf.mxu3 }
 0x222   :  { %v1654_v25 = vadd.f32 %v3580_v27, %v1653_v26  ;;  %v2757_v26 = vld [vmem:[#allocation11 + $0x30] sm:$0xff] }
 0x224   :  { %v3647_v34 = vadd.f32 %v1702_v60, %v1654_v25 }
 0x226   :  { %1851 = vmatmul.bf16.gmra.mxu2 %v3523_v63  ;;  %1900 = vmatmul.bf16.gmra.mxu3 %v3525_v56 }
 0x229   :  { %v1656_v40 = vpop.f32.mrf.mxu2  ;;  %v1705_v53 = vpop.f32.mrf.mxu3 }
 0x22a   :  { %v1657_v54 = vadd.f32 %v3580_v27, %v1656_v40 }
 0x22c   :  { %v3652_v22 = vadd.f32 %v1705_v53, %v1657_v54 }
 0x231   :  { %v1658_v5 = vpop.f32.mrf.mxu2  ;;  %v1707_v57 = vpop.f32.mrf.mxu3 }
 0x232   :  { %v1659_v55 = vadd.f32 %v3580_v27, %v1658_v5 }
 0x234   :  { %v3655_v11 = vadd.f32 %v1707_v57, %v1659_v55 }
 0x236   :  { %1856 = vmatmul.bf16.gmra.mxu2 %v3555_v0  ;;  %1905 = vmatmul.bf16.gmra.mxu3 %v3557_v15  ;;  %v2758_v0 = vld [vmem:[#allocation11 + $0x38] sm:$0xff] }
 0x237   :  { %2072 = vmatpush.bf16.msra.mxu0 %v2758_v0 }
 0x239   :  { %v1661_v59 = vpop.f32.mrf.mxu2  ;;  %v1710_v63 = vpop.f32.mrf.mxu3 }
 0x23a   :  { %v1662_v56 = vadd.f32 %v3580_v27, %v1661_v59 }
 0x23b   :  { %2073 = vmatpush.bf16.msra.mxu0 %v2757_v26 }
 0x23c   :  { %v3660_v52 = vadd.f32 %v1710_v63, %v1662_v56 }
 0x23f   :  { %2074 = vmatpush.bf16.msra.mxu0 %v2756_v58 }
 0x241   :  { %v1663_v10 = vpop.f32.mrf.mxu2  ;;  %v1712_v12 = vpop.f32.mrf.mxu3 }
 0x242   :  { %v1664_v29 = vadd.f32 %v3580_v27, %v1663_v10  ;;  %v1741_v10 = vpop.f32.mrf.mxu0 }
 0x243   :  { %2075 = vmatpush.bf16.msra.mxu0 %v2755_v32  ;;  %v2753_v32 = vld [vmem:[#allocation11 + $0x10] sm:$0xff] }
 0x244   :  { %v3665_v39 = vadd.f32 %v1712_v12, %v1664_v29 }
 0x249   :  { %v1822_v15 = vpop.f32.mrf.mxu2  ;;  %v1871_v6 = vpop.f32.mrf.mxu3 }
 0x24a   :  { %v1823_v13 = vadd.f32 %v1822_v15, %v1774_v1  ;;  %v1737_v1 = vadd.f32 %v3618_v18, %v3620_v33 }
 0x24c   :  { %v1872_v45 = vadd.f32 %v1871_v6, %v1823_v13  ;;  %v1786_v61 = vadd.f32 %v3622_v7, %v1737_v1 }
 0x24e   :  { %v1911_v35 = vmax.f32 %v1872_v45, 0.0 }
 0x251   :  { %v1824_v28 = vpop.f32.mrf.mxu2  ;;  %v1873_v37 = vpop.f32.mrf.mxu3 }
 0x252   :  { %v1825_v43 = vadd.f32 %v1824_v28, %v1776_v4 }
 0x254   :  { %v1874_v24 = vadd.f32 %v1873_v37, %v1825_v43  ;;  %v1744_v37 = vpop.f32.mrf.mxu0 }
 0x256   :  { %v1912_v50 = vmax.f32 %v1874_v24, 0.0 }
 0x258   :  { %v1927_v36 = vmax.f32 %v1911_v35, %v1912_v50  ;;  %v1793_v50 = vpop.f32.mrf.mxu1 }
 0x259   :  { %v1827_v42 = vpop.f32.mrf.mxu2  ;;  %v1876_v14 = vpop.f32.mrf.mxu3 }
 0x25a   :  { %v1828_v49 = vadd.f32 %v1827_v42, %v1779_v2  ;;  %v1928_v46 = vrot.slane %v1927_v36, 4 }
 0x25c   :  { %v1877_v60 = vadd.f32 %v1876_v14, %v1828_v49  ;;  %v1929_v25 = vmax.f32 %v1927_v36, %v1928_v46  ;;  %v2747_v46 = vld [vmem:[#allocation10 + $0x20] sm:$0xff] }
 0x25d   :  { %2168 = vmatpush.bf16.msra.mxu1 %v2747_v46  ;;  %v2745_v46 = vld [vmem:[#allocation10 + $0x10] sm:$0xff] }
 0x25e   :  { %v1930_v54 = vrot.slane %v1929_v25, 2  ;;  %v1913_v57 = vmax.f32 %v1877_v60, 0.0  ;;  %v1742_v60 = vadd.f32 %v1741_v10, %v3630_v44 }
 0x260   :  { %v1931_v59 = vmax.f32 %v1929_v25, %v1930_v54  ;;  %v1791_v47 = vadd.f32 %v1790_v31, %v1742_v60  ;;  %v2754_v31 = vld [vmem:[#allocation11 + $0x18] sm:$0xff] }
 0x261   :  { %v1829_v38 = vpop.f32.mrf.mxu2  ;;  %v1878_v40 = vpop.f32.mrf.mxu3  ;;  %2076 = vmatpush.bf16.msra.mxu0 %v2754_v31 }
 0x262   :  { %v1830_v53 = vadd.f32 %v1829_v38, %v1781_v41  ;;  %v1932_v0 = vrot.slane %v1931_v59, 1  ;;  %v1746_v38 = vpop.f32.mrf.mxu0 }
 0x264   :  { %v1879_v5 = vadd.f32 %v1878_v40, %v1830_v53  ;;  %v1933_v6 = vmax.f32 %v1931_v59, %v1932_v0 }
 0x265   :  { %2077 = vmatpush.bf16.msra.mxu0 %v2753_v32 }
 0x266   :  { %v1914_v55 = vmax.f32 %v1879_v5, 0.0  ;;  %v1983_v43 = vpack.c.bf16 %v1933_v6, %v1933_v6 }
 0x268   :  { %v1934_v63 = vmax.f32 %v1913_v57, %v1914_v55  ;;  %v2093_v36 = vunpack.c.l.b16 %v1983_v43  ;;  %v1795_v57 = vpop.f32.mrf.mxu1 }
 0x269   :  { %v1832_v23 = vpop.f32.mrf.mxu2  ;;  %v1881_v56 = vpop.f32.mrf.mxu3 }
 0x26a   :  { %v1935_v12 = vrot.slane %v1934_v63, 4  ;;  %v1833_v29 = vadd.f32 %v1832_v23, %v1784_v30  ;;  %v1749_v10 = vpop.f32.mrf.mxu0 }
 0x26c   :  { %v1936_v51 = vmax.f32 %v1934_v63, %v1935_v12  ;;  %v1882_v16 = vadd.f32 %v1881_v56, %v1833_v29  ;;  %v1745_v12 = vadd.f32 %v1744_v37, %v3635_v3 }
 0x26e   :  { %v1937_v15 = vrot.slane %v1936_v51, 2  ;;  %v1915_v33 = vmax.f32 %v1882_v16, 0.0 }
 0x270   :  { %v1938_v13 = vmax.f32 %v1936_v51, %v1937_v15  ;;  %v2746_v15 = vld [vmem:[#allocation10 + $0x18] sm:$0xff] }
 0x271   :  { %v1834_v62 = vpop.f32.mrf.mxu2  ;;  %v1883_v45 = vpop.f32.mrf.mxu3  ;;  %2169 = vmatpush.bf16.msra.mxu1 %v2746_v15 }
 0x272   :  { %v1939_v4 = vrot.slane %v1938_v13, 1  ;;  %v1835_v28 = vadd.f32 %v1834_v62, %v1786_v61 }
 0x274   :  { %v1940_v9 = vmax.f32 %v1938_v13, %v1939_v4  ;;  %v1884_v24 = vadd.f32 %v1883_v45, %v1835_v28  ;;  %v1794_v13 = vadd.f32 %v1793_v50, %v1745_v12  ;;  %v1751_v28 = vpop.f32.mrf.mxu0  ;;  %v1750_v50 = vadd.f32 %v1749_v10, %v3644_v21 }
 0x275   :  { %2170 = vmatpush.bf16.msra.mxu1 %v2745_v46 }
 0x276   :  { %v1984_v18 = vpack.c.bf16 %v1940_v9, %v1940_v9  ;;  %v1916_v35 = vmax.f32 %v1884_v24, 0.0 }
 0x278   :  { %v2094_v2 = vunpack.c.l.b16 %v1984_v18  ;;  %v1941_v42 = vmax.f32 %v1915_v33, %v1916_v35 }
 0x279   :  { %v1837_v14 = vpop.f32.mrf.mxu2  ;;  %v1886_v49 = vpop.f32.mrf.mxu3 }
 0x27a   :  { %v2102_v26 = vsel %vm2101_vm0, %v2094_v2, %v2093_v36  ;;  %v1942_v7 = vrot.slane %v1941_v42, 4  ;;  %v1838_v8 = vadd.f32 %v1837_v14, %v3627_v48  ;;  %v1649_v48 = vadd.f32 %v3580_v27, %v3637_v19  ;;  %v1798_v27 = vpop.f32.mrf.mxu1 }
 0x27c   :  { %v1943_v25 = vmax.f32 %v1941_v42, %v1942_v7  ;;  %v1887_v41 = vadd.f32 %v1886_v49, %v1838_v8  ;;  %v1698_v29 = vadd.f32 %v3639_v20, %v1649_v48  ;;  %v1754_v60 = vpop.f32.mrf.mxu0 }
 0x27d   :  { %v1755_v10 = vadd.f32 %v1754_v60, %v3652_v22 }
 0x27e   :  { %v1944_v40 = vrot.slane %v1943_v25, 2  ;;  %v1917_v44 = vmax.f32 %v1887_v41, 0.0  ;;  %v1747_v19 = vadd.f32 %v1746_v38, %v1698_v29  ;;  %v1799_v38 = vadd.f32 %v1798_v27, %v1750_v50  ;;  %v2743_v50 = vld [vmem:[#allocation10] sm:$0xff] }
 0x280   :  { %v1945_v53 = vmax.f32 %v1943_v25, %v1944_v40  ;;  %v1796_v3 = vadd.f32 %v1795_v57, %v1747_v19  ;;  %v1752_v25 = vadd.f32 %v1751_v28, %v3647_v34 }
 0x281   :  { %v1839_v54 = vpop.f32.mrf.mxu2  ;;  %v1888_v5 = vpop.f32.mrf.mxu3 }
 0x282   :  { %v1946_v55 = vrot.slane %v1945_v53, 1  ;;  %v1840_v59 = vadd.f32 %v1839_v54, %v1791_v47  ;;  %v1800_v33 = vpop.f32.mrf.mxu1 }
 0x283   :  { %v1801_v21 = vadd.f32 %v1800_v33, %v1752_v25  ;;  %v2766_v25 = vld [vmem:[#allocation13 + $0x38] sm:$0xff] }
 0x284   :  { %v1947_v63 = vmax.f32 %v1945_v53, %v1946_v55  ;;  %v1889_v30 = vadd.f32 %v1888_v5, %v1840_v59  ;;  %2253 = vmatpush.bf16.msra.mxu2 %v2766_v25 }
 0x286   :  { %v1985_v23 = vpack.c.bf16 %v1947_v63, %v1947_v63  ;;  %v1918_v56 = vmax.f32 %v1889_v30, 0.0 }
 0x288   :  { %v2095_v58 = vunpack.c.l.b16 %v1985_v23  ;;  %v1948_v17 = vmax.f32 %v1917_v44, %v1918_v56  ;;  %v1756_v23 = vpop.f32.mrf.mxu0 }
 0x289   :  { %v1842_v1 = vpop.f32.mrf.mxu2  ;;  %v1891_v0 = vpop.f32.mrf.mxu3  ;;  %v1757_v15 = vadd.f32 %v1756_v23, %v3655_v11 }
 0x28a   :  { %v2104_v51 = vsel %vm2103_vm1, %v2095_v58, %v2102_v26  ;;  %v1949_v16 = vrot.slane %v1948_v17, 4  ;;  %v1843_v62 = vadd.f32 %v1842_v1, %v1794_v13  ;;  %v1803_v47 = vpop.f32.mrf.mxu1  ;;  %v2752_v58 = vld [vmem:[#allocation11 + $0x8] sm:$0xff] }
 0x28b   :  { %2078 = vmatpush.bf16.msra.mxu0 %v2752_v58  ;;  %v1804_v19 = vadd.f32 %v1803_v47, %v1755_v10 }
 0x28c   :  { %v1950_v6 = vmax.f32 %v1948_v17, %v1949_v16  ;;  %v1892_v43 = vadd.f32 %v1891_v0, %v1843_v62  ;;  %v2744_v17 = vld [vmem:[#allocation10 + $0x8] sm:$0xff] }
 0x28d   :  { %2171 = vmatpush.bf16.msra.mxu1 %v2744_v17 }
 0x28e   :  { %v1951_v61 = vrot.slane %v1950_v6, 2  ;;  %v1919_v36 = vmax.f32 %v1892_v43, 0.0 }
 0x290   :  { %v1952_v45 = vmax.f32 %v1950_v6, %v1951_v61  ;;  %v1759_v61 = vpop.f32.mrf.mxu0 }
 0x291   :  { %v1844_v4 = vpop.f32.mrf.mxu2  ;;  %v1893_v20 = vpop.f32.mrf.mxu3  ;;  %v1760_v11 = vadd.f32 %v1759_v61, %v3660_v52  ;;  %2172 = vmatpush.bf16.msra.mxu1 %v2743_v50  ;;  %v2765_v52 = vld [vmem:[#allocation13 + $0x30] sm:$0xff] }
 0x292   :  { %v1953_v37 = vrot.slane %v1952_v45, 1  ;;  %v1845_v9 = vadd.f32 %v1844_v4, %v1796_v3  ;;  %v1805_v31 = vpop.f32.mrf.mxu1  ;;  %2254 = vmatpush.bf16.msra.mxu2 %v2765_v52 }
 0x293   :  { %v1806_v22 = vadd.f32 %v1805_v31, %v1757_v15 }
 0x294   :  { %v1954_v24 = vmax.f32 %v1952_v45, %v1953_v37  ;;  %v1894_v18 = vadd.f32 %v1893_v20, %v1845_v9 }
 0x296   :  { %v1986_v35 = vpack.c.bf16 %v1954_v24, %v1954_v24  ;;  %v1920_v2 = vmax.f32 %v1894_v18, 0.0  ;;  %v2751_v24 = vld [vmem:[#allocation11] sm:$0xff] }
 0x297   :  { %2079 = vmatpush.bf16.msra.mxu0 %v2751_v24 }
 0x298   :  { %v2096_v42 = vunpack.c.l.b16 %v1986_v35  ;;  %v1955_v14 = vmax.f32 %v1919_v36, %v1920_v2 }
 0x299   :  { %v1847_v49 = vpop.f32.mrf.mxu2  ;;  %v1896_v26 = vpop.f32.mrf.mxu3 }
 0x29a   :  { %v2106_v7 = vsel %vm2105_vm4, %v2096_v42, %v2104_v51  ;;  %v1956_v8 = vrot.slane %v1955_v14, 4  ;;  %v1848_v53 = vadd.f32 %v1847_v49, %v1799_v38  ;;  %v1808_v9 = vpop.f32.mrf.mxu1  ;;  %v2007_v42 = vld [vmem:[#allocation5] sm:$0xf] }
 0x29b   :  { %2080 = vmatmul.bf16.vlgmr.msra.gmra.mxu0 %v2007_v42  ;;  %v1809_v60 = vadd.f32 %v1808_v9, %v1760_v11 }
 0x29c   :  { %v1957_v41 = vmax.f32 %v1955_v14, %v1956_v8  ;;  %v1897_v59 = vadd.f32 %v1896_v26, %v1848_v53  ;;  %v1761_v8 = vpop.f32.mrf.mxu0 }
 0x29d   :  { %v1762_v32 = vadd.f32 %v1761_v8, %v3665_v39 }
 0x29e   :  { %v1958_v40 = vrot.slane %v1957_v41, 2  ;;  %v1921_v56 = vmax.f32 %v1897_v59, 0.0  ;;  %v2764_v59 = vld [vmem:[#allocation13 + $0x28] sm:$0xff] }
 0x29f   :  { %2255 = vmatpush.bf16.msra.mxu2 %v2764_v59 }
 0x2a0   :  { %v1959_v54 = vmax.f32 %v1957_v41, %v1958_v40 }
 0x2a1   :  { %v1849_v5 = vpop.f32.mrf.mxu2  ;;  %v1898_v57 = vpop.f32.mrf.mxu3 }
 0x2a2   :  { %v1960_v55 = vrot.slane %v1959_v54, 1  ;;  %v1850_v48 = vadd.f32 %v1849_v5, %v1801_v21  ;;  %v1810_v40 = vpop.f32.mrf.mxu1 }
 0x2a3   :  { %v1811_v47 = vadd.f32 %v1810_v40, %v1762_v32 }
 0x2a4   :  { %v1961_v63 = vmax.f32 %v1959_v54, %v1960_v55  ;;  %v1899_v30 = vadd.f32 %v1898_v57, %v1850_v48 }
 0x2a6   :  { %v1987_v44 = vpack.c.bf16 %v1961_v63, %v1961_v63  ;;  %v1922_v34 = vmax.f32 %v1899_v30, 0.0 }
 0x2a8   :  { %v2097_v12 = vunpack.c.l.b16 %v1987_v44  ;;  %v1962_v29 = vmax.f32 %v1921_v56, %v1922_v34  ;;  %v2763_v44 = vld [vmem:[#allocation13 + $0x20] sm:$0xff] }
 0x2a9   :  { %v1852_v1 = vpop.f32.mrf.mxu2  ;;  %v1901_v0 = vpop.f32.mrf.mxu3  ;;  %2256 = vmatpush.bf16.msra.mxu2 %v2763_v44 }
 0x2aa   :  { %v2108_v51 = vsel %vm2107_vm5, %v2097_v12, %v2106_v7  ;;  %v1963_v16 = vrot.slane %v1962_v29, 4  ;;  %v1853_v13 = vadd.f32 %v1852_v1, %v1804_v19  ;;  %v2761_v1 = vld [vmem:[#allocation13 + $0x10] sm:$0xff] }
 0x2ac   :  { %v1964_v27 = vmax.f32 %v1962_v29, %v1963_v16  ;;  %v1902_v20 = vadd.f32 %v1901_v0, %v1853_v13  ;;  %v2762_v29 = vld [vmem:[#allocation13 + $0x18] sm:$0xff]  ;;  %v2760_v16 = vld [vmem:[#allocation13 + $0x8] sm:$0xff]  ;;  %v2759_v13 = vld [vmem:[#allocation13] sm:$0xff] }
 0x2ad   :  { %2257 = vmatpush.bf16.msra.mxu2 %v2762_v29 }
 0x2ae   :  { %v1965_v6 = vrot.slane %v1964_v27, 2  ;;  %v1923_v33 = vmax.f32 %v1902_v20, 0.0 }
 0x2b0   :  { %v1966_v62 = vmax.f32 %v1964_v27, %v1965_v6 }
 0x2b1   :  { %v1854_v45 = vpop.f32.mrf.mxu2  ;;  %v1903_v3 = vpop.f32.mrf.mxu3  ;;  %2258 = vmatpush.bf16.msra.mxu2 %v2761_v1 }
 0x2b2   :  { %v1967_v4 = vrot.slane %v1966_v62, 1  ;;  %v1855_v28 = vadd.f32 %v1854_v45, %v1806_v22  ;;  %v2780_v22 = vld [vmem:[%s3712_s8] ss:$0 sm:$0xff] }
 0x2b4   :  { %v1968_v37 = vmax.f32 %v1966_v62, %v1967_v4  ;;  %v1904_v43 = vadd.f32 %v1903_v3, %v1855_v28 }
 0x2b5   :  { %2259 = vmatpush.bf16.msra.mxu2 %v2760_v16 }
 0x2b6   :  { %v1988_v18 = vpack.c.bf16 %v1968_v37, %v1968_v37  ;;  %v1924_v35 = vmax.f32 %v1904_v43, 0.0  ;;  %v2781_v43 = vld [vmem:[%s3714_s10] ss:$0 sm:$0xff] }
 0x2b8   :  { %v2098_v36 = vunpack.c.l.b16 %v1988_v18  ;;  %v1969_v2 = vmax.f32 %v1923_v33, %v1924_v35 }
 0x2b9   :  { %v1857_v14 = vpop.f32.mrf.mxu2  ;;  %v1906_v49 = vpop.f32.mrf.mxu3  ;;  %2260 = vmatpush.bf16.msra.mxu2 %v2759_v13 }
 0x2ba   :  { %v2110_v26 = vsel %vm2109_vm6, %v2098_v36, %v2108_v51  ;;  %v1970_v7 = vrot.slane %v1969_v2, 4  ;;  %v1858_v38 = vadd.f32 %v1857_v14, %v1809_v60 }
 0x2bc   :  { %v1971_v46 = vmax.f32 %v1969_v2, %v1970_v7  ;;  %v1907_v5 = vadd.f32 %v1906_v49, %v1858_v38 }
 0x2be   :  { %v1972_v41 = vrot.slane %v1971_v46, 2  ;;  %v1925_v30 = vmax.f32 %v1907_v5, 0.0 }
 0x2c0   :  { %v1973_v53 = vmax.f32 %v1971_v46, %v1972_v41 }
 0x2c1   :  { %v1859_v54 = vpop.f32.mrf.mxu2  ;;  %v1908_v55 = vpop.f32.mrf.mxu3 }
 0x2c2   :  { %v1974_v21 = vrot.slane %v1973_v53, 1  ;;  %v1860_v57 = vadd.f32 %v1859_v54, %v1811_v47 }
 0x2c4   :  { %v1975_v48 = vmax.f32 %v1973_v53, %v1974_v21  ;;  %v1909_v63 = vadd.f32 %v1908_v55, %v1860_v57 }
 0x2c6   :  { %v1989_v39 = vpack.c.bf16 %v1975_v48, %v1975_v48  ;;  %v1926_v23 = vmax.f32 %v1909_v63, 0.0 }
 0x2c8   :  { %v2099_v56 = vunpack.c.l.b16 %v1989_v39  ;;  %v1976_v34 = vmax.f32 %v1925_v30, %v1926_v23 }
 0x2ca   :  { %v1977_v10 = vrot.slane %v1976_v34, 4  ;;  %v2112_v12 = vsel %vm2111_vm7, %v2099_v56, %v2110_v26 }
 0x2cc   :  { %v1978_v58 = vmax.f32 %v1976_v34, %v1977_v10 }
 0x2ce   :  { %v1979_v17 = vrot.slane %v1978_v58, 2 }
 0x2d0   :  { %v1980_v0 = vmax.f32 %v1978_v58, %v1979_v17 }
 0x2d2   :  { %v1981_v51 = vrot.slane %v1980_v0, 1 }
 0x2d4   :  { %v1982_v31 = vmax.f32 %v1980_v0, %v1981_v51 }
 0x2d6   :  { %v1990_v15 = vpack.c.bf16 %v1982_v31, %v1982_v31 }
 0x2d8   :  { %v2100_v27 = vunpack.c.l.b16 %v1990_v15 }
 0x2da   :  { %v2114_v19 = vsel %vm2113_vm8, %v2100_v27, %v2112_v12 }
 0x2db   :  { %v2115_v6 = vpack.c.b16 %v2114_v19, %v2114_v19 }
 0x2dd   :  { %2173 = vmatmul.bf16.vlgmr.msra.gmra.mxu1 %v2115_v6 }
 0x318   :  { %v2081_v61 = vpop.f32.mrf.mxu0 }
 0x320   :  { %v2083_v62 = vpop.f32.mrf.mxu0 }
 0x35a   :  { %v2174_v45 = vpop.f32.mrf.mxu1 }
 0x35b   :  { %v2175_v3 = vadd.f32 %v2174_v45, %v2081_v61 }
 0x35d   :  { %v2182_v4 = vadd.f32 %v2780_v22, %v2175_v3 }
 0x35f   :  { %v2183_v20 = vmax.f32 %v2182_v4, 0.0 }
 0x361   :  { %v2184_v28 = vpack.c.bf16 %v2183_v20, %v2183_v20 }
 0x362   :  { %v2176_v37 = vpop.f32.mrf.mxu1 }
 0x363   :  { %2261 = vmatmul.bf16.vlgmr.msra.gmra.mxu2 %v2184_v28 }
 0x3e6   :  { %v2262_v9 = vpop.f32.mrf.mxu2 }
 0x3e7   :  { %v2263_v24 = vadd.f32 %v2781_v43, %v2262_v9 }
 0x3e9   :  { %2266 = vst [vmem:[#allocation14] sm:$0xff] %v2263_v24 }
 0x3ea   :  { %2277 = dma.vmem_to_hbm [thread:$0]  %s2273_s7, 128, %s2275_s18, [#allocation4]  }
 0x3ee   :  { %v2264_v18 = vpop.f32.mrf.mxu2 }
 0x3ef   :  { %2982 = dma.done.wait [#allocation4], 128  }
 0x3f0   :  { %2983 = vsyncadd [#allocation4], 4294967168 }
 0x3f1   :  { %2282 = vsyncpa [#allocation3], 1 }
 0x3f2   :  { %2283 = vsyncpa [#allocation6], 1 }
 0x3f3   :  { %2284 = vsyncpa [#allocation9], 1 }
 0x3f4   :  { %2285 = vsyncpa [#allocation12], 1 }
 0x3f5   :  { %2286 = vsyncpa [#allocation4], 1 }

</bundles_post_ra>
